<compile_context>
chip_gen: v5e
topology: v5e:2x2
jax: 0.10.0
libtpu: 0.0.40
codegen_flags: <defaults>
</compile_context>

<pallas_src>
import jax
import jax.numpy as jnp
from jax.experimental import pallas as pl
from jax.experimental.pallas import tpu as pltpu


# ----------------------------------------------------------------------------
# Fused Pallas kernel (all layers + FC head, whole forward in one invocation)
# ----------------------------------------------------------------------------
def make_fused_lstm_kernel(T, B, hidden_size, num_layers):
    H = hidden_size

    def kernel(x_ref, w_ih0_ref, w_ih_rest_ref, w_hh_ref, bias_ref, fc_ref,
               out_ref, seq_scratch):
        # x_ref        : (T*B, D)        time-major, flattened
        # w_ih0_ref    : (D, 4H)         layer-0 input weights
        # w_ih_rest_ref: (max(L-1,1), H, 4H)  layer>0 input weights (stacked)
        # w_hh_ref     : (L, H, 4H)      recurrent weights (stacked)
        # bias_ref     : (L, 1, 4H)      b_ih + b_hh (stacked)
        # fc_ref       : (2, H)          row 0 = fc weight, row 1 = [fc bias, 0...]
        # out_ref      : (B, 1)
        # seq_scratch  : VMEM (T*B, H)   inter-layer hidden sequence

        h = None
        for layer in range(num_layers):
            last_layer = layer == num_layers - 1
            w_hh = w_hh_ref[layer]                   # (H, 4H)
            bias = bias_ref[layer]                   # (1, 4H)

            if layer == 0:
                x_all = x_ref[...]                   # (T*B, D)
                w_ih = w_ih0_ref[...]                # (D, 4H)
            else:
                x_all = seq_scratch[...]             # (T*B, H)
                w_ih = w_ih_rest_ref[layer - 1]      # (H, 4H)

            # Whole-sequence input projection: one MXU matmul per layer,
            # bias folded in once (off the recurrent critical path).
            x_proj_all = jnp.dot(
                x_all, w_ih, preferred_element_type=jnp.float32) + bias  # (T*B, 4H)

            h = jnp.zeros((B, H), jnp.float32)
            c = jnp.zeros((B, H), jnp.float32)
            for t in range(T):
                # Serial chain: exactly one MXU matmul per step.
                gates = x_proj_all[t * B:(t + 1) * B, :] + jnp.dot(
                    h, w_hh, preferred_element_type=jnp.float32)         # (B, 4H)
                # Two full-vreg transcendentals instead of four partial ones.
                sig = jax.nn.sigmoid(gates)          # (B, 4H) -> i, f, o
                th = jnp.tanh(gates)                 # (B, 4H) -> g
                i_g = sig[:, 0 * H:1 * H]
                f_g = sig[:, 1 * H:2 * H]
                g_g = th[:, 2 * H:3 * H]
                o_g = sig[:, 3 * H:4 * H]
                c = f_g * c + i_g * g_g
                h = o_g * jnp.tanh(c)
                if not last_layer:
                    # Stash h_t for the next layer's batched input projection.
                    seq_scratch[t * B:(t + 1) * B, :] = h

        # Fused FC head: Linear(H, 1) as VPU multiply + lane reduction
        # (avoids a 1-lane-wide MXU matmul and an extra kernel launch).
        pred = jnp.sum(h * fc_ref[0:1, :], axis=-1, keepdims=True) \
            + fc_ref[1:2, 0:1]                                           # (B, 1)
        out_ref[...] = pred.astype(out_ref.dtype)

    return kernel


# ----------------------------------------------------------------------------
# Wrapper
# ----------------------------------------------------------------------------
def lstm_forecast_forward(x_btd, params):
    """Full LSTMForecast forward. x_btd: (B, T, input_size) -> (B,)."""
    B, T, D = x_btd.shape
    num_layers = len(params["lstm_layers"])
    H = params["lstm_layers"][0][1].shape[0]

    # Pad batch to a full f32 sublane group (8). Padded rows are independent
    # lanes of work and essentially free (latency-bound recurrence).
    B_pad = max(8, ((B + 7) // 8) * 8)
    x_pad = jnp.zeros((B_pad, T, D), jnp.float32).at[:B].set(
        x_btd.astype(jnp.float32))

    # Time-major then flatten: (B,T,D) -> (T,B,D) -> (T*B, D) so each layer's
    # input projection is a single MXU matmul.
    x_flat = jnp.transpose(x_pad, (1, 0, 2)).reshape(T * B_pad, D)

    # Consolidate weights to cut DMA count (6 inputs instead of 9).
    w_ih0 = params["lstm_layers"][0][0]                              # (D, 4H)
    if num_layers > 1:
        w_ih_rest = jnp.stack(
            [params["lstm_layers"][l][0] for l in range(1, num_layers)])
    else:
        w_ih_rest = jnp.zeros((1, H, 4 * H), jnp.float32)            # dummy, unread
    w_hh_all = jnp.stack([p[1] for p in params["lstm_layers"]])      # (L, H, 4H)
    bias_all = jnp.stack([p[2] for p in params["lstm_layers"]])      # (L, 1, 4H)
    fc_b_row = jnp.zeros((1, H), jnp.float32).at[0, 0].set(params["fc_b"][0, 0])
    fc_packed = jnp.concatenate([params["fc_w"], fc_b_row], axis=0)  # (2, H)

    kernel = make_fused_lstm_kernel(T, B_pad, H, num_layers)
    pred = pl.pallas_call(
        kernel,
        out_shape=jax.ShapeDtypeStruct((B_pad, 1), jnp.float32),
        scratch_shapes=[pltpu.VMEM((T * B_pad, H), jnp.float32)],
        compiler_params=pltpu.CompilerParams(
            vmem_limit_bytes=32 * 1024 * 1024,
        ),
    )(x_flat, w_ih0, w_ih_rest, w_hh_all, bias_all, fc_packed)       # (B_pad, 1)

    return pred[:B, 0]                                               # (B,)


# ----------------------------------------------------------------------------
# Deterministic parameter init (matches PyTorch LSTM/Linear shapes)
# ----------------------------------------------------------------------------
def init_params(key, input_size, hidden_size, num_layers):
    H = hidden_size
    bound = 1.0 / jnp.sqrt(jnp.float32(H))
    layers = []
    for layer in range(num_layers):
        in_dim = input_size if layer == 0 else H
        key, k1, k2, k3, k4 = jax.random.split(key, 5)
        # PyTorch stores (4H, in_dim); we store transposed (in_dim, 4H).
        w_ih = jax.random.uniform(k1, (in_dim, 4 * H), jnp.float32, -bound, bound)
        w_hh = jax.random.uniform(k2, (H, 4 * H), jnp.float32, -bound, bound)
        b_ih = jax.random.uniform(k3, (4 * H,), jnp.float32, -bound, bound)
        b_hh = jax.random.uniform(k4, (4 * H,), jnp.float32, -bound, bound)
        layers.append((w_ih, w_hh, (b_ih + b_hh).reshape(1, 4 * H)))
    key, k5, k6 = jax.random.split(key, 3)
    fc_bound = 1.0 / jnp.sqrt(jnp.float32(H))
    # fc weight stored as a (1, H) row so the kernel can do a VPU reduce.
    fc_w = jax.random.uniform(k5, (1, H), jnp.float32, -fc_bound, fc_bound)
    fc_b = jax.random.uniform(k6, (1, 1), jnp.float32, -fc_bound, fc_bound)
    return {"lstm_layers": layers, "fc_w": fc_w, "fc_b": fc_b}


# ----------------------------------------------------------------------------
# Pure-JAX reference (same math) for self-validation
# ----------------------------------------------------------------------------
def reference_forward(x_btd, params):
    B = x_btd.shape[0]
    seq = jnp.transpose(x_btd, (1, 0, 2)).astype(jnp.float32)  # (T, B, D)
    for (w_ih, w_hh, bias) in params["lstm_layers"]:
        H = w_hh.shape[0]
        h = jnp.zeros((B, H), jnp.float32)
        c = jnp.zeros((B, H), jnp.float32)
        outs = []
        for t in range(seq.shape[0]):
            gates = seq[t] @ w_ih + h @ w_hh + bias
            i = jax.nn.sigmoid(gates[:, 0 * H:1 * H])
            f = jax.nn.sigmoid(gates[:, 1 * H:2 * H])
            g = jnp.tanh(gates[:, 2 * H:3 * H])
            o = jax.nn.sigmoid(gates[:, 3 * H:4 * H])
            c = f * c + i * g
            h = o * jnp.tanh(c)
            outs.append(h)
        seq = jnp.stack(outs, axis=0)
    pred = seq[-1] @ params["fc_w"].T + params["fc_b"]          # (B, 1)
    return jnp.squeeze(pred, axis=-1)


# ----------------------------------------------------------------------------
if __name__ == "__main__":
    B, T = 2, 8
    input_size, hidden_size, num_layers = 4, 32, 2

    key = jax.random.PRNGKey(0)
    key, kx, kp = jax.random.split(key, 3)
    x = jax.random.normal(kx, (B, T, input_size), jnp.float32)
    params = init_params(kp, input_size, hidden_size, num_layers)

    out = lstm_forecast_forward(x, params)
    out = jax.block_until_ready(out)

    ref = reference_forward(x, params)
    assert out.shape == (B,), out.shape
    assert jnp.allclose(out, ref, atol=1e-4, rtol=1e-4), (out, ref)

    print("KERNEL_OK")
</pallas_src>

<mosaic_0001>
module attributes {stable_mosaic.version = 11 : i64} {
  func.func @kernel(%arg0: memref<64x4xf32, #tpu.memory_space<vmem>>, %arg1: memref<4x128xf32, #tpu.memory_space<vmem>>, %arg2: memref<1x32x128xf32, #tpu.memory_space<vmem>>, %arg3: memref<2x32x128xf32, #tpu.memory_space<vmem>>, %arg4: memref<2x1x128xf32, #tpu.memory_space<vmem>>, %arg5: memref<2x32xf32, #tpu.memory_space<vmem>>, %arg6: memref<8x1xf32, #tpu.memory_space<vmem>>, %arg7: memref<64x32xf32, #tpu.memory_space<vmem>>) attributes {dimension_semantics = [], scalar_prefetch = 0 : i64, scratch_operands = 1 : i64, tpu.core_type = #tpu.core_type<tc>} {
    %c0 = arith.constant 0 : index
    %c0_0 = arith.constant 0 : index
    %c0_1 = arith.constant 0 : index
    %0 = vector.load %arg3[%c0, %c0_0, %c0_1] : memref<2x32x128xf32, #tpu.memory_space<vmem>>, vector<1x32x128xf32>
    %1 = vector.shape_cast %0 : vector<1x32x128xf32> to vector<32x128xf32>
    %c0_2 = arith.constant 0 : index
    %c0_3 = arith.constant 0 : index
    %c0_4 = arith.constant 0 : index
    %2 = vector.load %arg4[%c0_2, %c0_3, %c0_4] : memref<2x1x128xf32, #tpu.memory_space<vmem>>, vector<1x1x128xf32>
    %3 = vector.shape_cast %2 : vector<1x1x128xf32> to vector<1x128xf32>
    %c0_5 = arith.constant 0 : index
    %c0_6 = arith.constant 0 : index
    %4 = vector.load %arg0[%c0_5, %c0_6] : memref<64x4xf32, #tpu.memory_space<vmem>>, vector<64x4xf32>
    %c0_7 = arith.constant 0 : index
    %c0_8 = arith.constant 0 : index
    %5 = vector.load %arg1[%c0_7, %c0_8] : memref<4x128xf32, #tpu.memory_space<vmem>>, vector<4x128xf32>
    %cst = arith.constant dense<0.000000e+00> : vector<64x128xf32>
    %6 = tpu.matmul %4, %5, %cst {dimension_numbers = #tpu.dot_dimension_numbers<[1], [0], [0], [1], [0, 0, 1, 1], [], []>} : vector<64x4xf32>, vector<4x128xf32>, vector<64x128xf32> -> vector<64x128xf32>
    %7 = vector.broadcast %3 : vector<1x128xf32> to vector<64x128xf32>
    %8 = arith.addf %6, %7 : vector<64x128xf32>
    %cst_9 = arith.constant 0.000000e+00 : f32
    %9 = vector.broadcast %cst_9 : f32 to vector<8x32xf32>
    %cst_10 = arith.constant 0.000000e+00 : f32
    %10 = vector.broadcast %cst_10 : f32 to vector<8x32xf32>
    %11 = vector.extract_strided_slice %8 {offsets = [0, 0], sizes = [8, 128], strides = [1, 1]} : vector<64x128xf32> to vector<8x128xf32>
    %cst_11 = arith.constant dense<0.000000e+00> : vector<8x128xf32>
    %12 = tpu.matmul %9, %1, %cst_11 {dimension_numbers = #tpu.dot_dimension_numbers<[1], [0], [0], [1], [0, 0, 1, 1], [], []>} : vector<8x32xf32>, vector<32x128xf32>, vector<8x128xf32> -> vector<8x128xf32>
    %13 = arith.addf %11, %12 : vector<8x128xf32>
    %14 = arith.negf %13 : vector<8x128xf32>
    %15 = math.exp %14 : vector<8x128xf32>
    %cst_12 = arith.constant 1.000000e+00 : f32
    %16 = vector.broadcast %cst_12 : f32 to vector<8x128xf32>
    %17 = arith.addf %16, %15 : vector<8x128xf32>
    %18 = arith.divf %16, %17 : vector<8x128xf32>
    %19 = math.tanh %13 : vector<8x128xf32>
    %20 = vector.extract_strided_slice %18 {offsets = [0, 0], sizes = [8, 32], strides = [1, 1]} : vector<8x128xf32> to vector<8x32xf32>
    %21 = vector.extract_strided_slice %18 {offsets = [0, 32], sizes = [8, 32], strides = [1, 1]} : vector<8x128xf32> to vector<8x32xf32>
    %22 = vector.extract_strided_slice %19 {offsets = [0, 64], sizes = [8, 32], strides = [1, 1]} : vector<8x128xf32> to vector<8x32xf32>
    %23 = vector.extract_strided_slice %18 {offsets = [0, 96], sizes = [8, 32], strides = [1, 1]} : vector<8x128xf32> to vector<8x32xf32>
    %24 = arith.mulf %21, %10 : vector<8x32xf32>
    %25 = arith.mulf %20, %22 : vector<8x32xf32>
    %26 = arith.addf %24, %25 : vector<8x32xf32>
    %27 = math.tanh %26 : vector<8x32xf32>
    %28 = arith.mulf %23, %27 : vector<8x32xf32>
    %c0_13 = arith.constant 0 : index
    %c0_14 = arith.constant 0 : index
    %29 = vector.load %arg7[%c0_13, %c0_14] : memref<64x32xf32, #tpu.memory_space<vmem>>, vector<8x32xf32>
    tpu.vector_store %arg7[%c0_13, %c0_14], %28 {strides = array<i32>} : memref<64x32xf32, #tpu.memory_space<vmem>>, vector<8x32xf32>,
    %30 = vector.extract_strided_slice %8 {offsets = [8, 0], sizes = [8, 128], strides = [1, 1]} : vector<64x128xf32> to vector<8x128xf32>
    %cst_15 = arith.constant dense<0.000000e+00> : vector<8x128xf32>
    %31 = tpu.matmul %28, %1, %cst_15 {dimension_numbers = #tpu.dot_dimension_numbers<[1], [0], [0], [1], [0, 0, 1, 1], [], []>} : vector<8x32xf32>, vector<32x128xf32>, vector<8x128xf32> -> vector<8x128xf32>
    %32 = arith.addf %30, %31 : vector<8x128xf32>
    %33 = arith.negf %32 : vector<8x128xf32>
    %34 = math.exp %33 : vector<8x128xf32>
    %cst_16 = arith.constant 1.000000e+00 : f32
    %35 = vector.broadcast %cst_16 : f32 to vector<8x128xf32>
    %36 = arith.addf %35, %34 : vector<8x128xf32>
    %37 = arith.divf %35, %36 : vector<8x128xf32>
    %38 = math.tanh %32 : vector<8x128xf32>
    %39 = vector.extract_strided_slice %37 {offsets = [0, 0], sizes = [8, 32], strides = [1, 1]} : vector<8x128xf32> to vector<8x32xf32>
    %40 = vector.extract_strided_slice %37 {offsets = [0, 32], sizes = [8, 32], strides = [1, 1]} : vector<8x128xf32> to vector<8x32xf32>
    %41 = vector.extract_strided_slice %38 {offsets = [0, 64], sizes = [8, 32], strides = [1, 1]} : vector<8x128xf32> to vector<8x32xf32>
    %42 = vector.extract_strided_slice %37 {offsets = [0, 96], sizes = [8, 32], strides = [1, 1]} : vector<8x128xf32> to vector<8x32xf32>
    %43 = arith.mulf %40, %26 : vector<8x32xf32>
    %44 = arith.mulf %39, %41 : vector<8x32xf32>
    %45 = arith.addf %43, %44 : vector<8x32xf32>
    %46 = math.tanh %45 : vector<8x32xf32>
    %47 = arith.mulf %42, %46 : vector<8x32xf32>
    %c8 = arith.constant 8 : index
    %c0_17 = arith.constant 0 : index
    %48 = vector.load %arg7[%c8, %c0_17] : memref<64x32xf32, #tpu.memory_space<vmem>>, vector<8x32xf32>
    tpu.vector_store %arg7[%c8, %c0_17], %47 {strides = array<i32>} : memref<64x32xf32, #tpu.memory_space<vmem>>, vector<8x32xf32>,
    %49 = vector.extract_strided_slice %8 {offsets = [16, 0], sizes = [8, 128], strides = [1, 1]} : vector<64x128xf32> to vector<8x128xf32>
    %cst_18 = arith.constant dense<0.000000e+00> : vector<8x128xf32>
    %50 = tpu.matmul %47, %1, %cst_18 {dimension_numbers = #tpu.dot_dimension_numbers<[1], [0], [0], [1], [0, 0, 1, 1], [], []>} : vector<8x32xf32>, vector<32x128xf32>, vector<8x128xf32> -> vector<8x128xf32>
    %51 = arith.addf %49, %50 : vector<8x128xf32>
    %52 = arith.negf %51 : vector<8x128xf32>
    %53 = math.exp %52 : vector<8x128xf32>
    %cst_19 = arith.constant 1.000000e+00 : f32
    %54 = vector.broadcast %cst_19 : f32 to vector<8x128xf32>
    %55 = arith.addf %54, %53 : vector<8x128xf32>
    %56 = arith.divf %54, %55 : vector<8x128xf32>
    %57 = math.tanh %51 : vector<8x128xf32>
    %58 = vector.extract_strided_slice %56 {offsets = [0, 0], sizes = [8, 32], strides = [1, 1]} : vector<8x128xf32> to vector<8x32xf32>
    %59 = vector.extract_strided_slice %56 {offsets = [0, 32], sizes = [8, 32], strides = [1, 1]} : vector<8x128xf32> to vector<8x32xf32>
    %60 = vector.extract_strided_slice %57 {offsets = [0, 64], sizes = [8, 32], strides = [1, 1]} : vector<8x128xf32> to vector<8x32xf32>
    %61 = vector.extract_strided_slice %56 {offsets = [0, 96], sizes = [8, 32], strides = [1, 1]} : vector<8x128xf32> to vector<8x32xf32>
    %62 = arith.mulf %59, %45 : vector<8x32xf32>
    %63 = arith.mulf %58, %60 : vector<8x32xf32>
    %64 = arith.addf %62, %63 : vector<8x32xf32>
    %65 = math.tanh %64 : vector<8x32xf32>
    %66 = arith.mulf %61, %65 : vector<8x32xf32>
    %c16 = arith.constant 16 : index
    %c0_20 = arith.constant 0 : index
    %67 = vector.load %arg7[%c16, %c0_20] : memref<64x32xf32, #tpu.memory_space<vmem>>, vector<8x32xf32>
    tpu.vector_store %arg7[%c16, %c0_20], %66 {strides = array<i32>} : memref<64x32xf32, #tpu.memory_space<vmem>>, vector<8x32xf32>,
    %68 = vector.extract_strided_slice %8 {offsets = [24, 0], sizes = [8, 128], strides = [1, 1]} : vector<64x128xf32> to vector<8x128xf32>
    %cst_21 = arith.constant dense<0.000000e+00> : vector<8x128xf32>
    %69 = tpu.matmul %66, %1, %cst_21 {dimension_numbers = #tpu.dot_dimension_numbers<[1], [0], [0], [1], [0, 0, 1, 1], [], []>} : vector<8x32xf32>, vector<32x128xf32>, vector<8x128xf32> -> vector<8x128xf32>
    %70 = arith.addf %68, %69 : vector<8x128xf32>
    %71 = arith.negf %70 : vector<8x128xf32>
    %72 = math.exp %71 : vector<8x128xf32>
    %cst_22 = arith.constant 1.000000e+00 : f32
    %73 = vector.broadcast %cst_22 : f32 to vector<8x128xf32>
    %74 = arith.addf %73, %72 : vector<8x128xf32>
    %75 = arith.divf %73, %74 : vector<8x128xf32>
    %76 = math.tanh %70 : vector<8x128xf32>
    %77 = vector.extract_strided_slice %75 {offsets = [0, 0], sizes = [8, 32], strides = [1, 1]} : vector<8x128xf32> to vector<8x32xf32>
    %78 = vector.extract_strided_slice %75 {offsets = [0, 32], sizes = [8, 32], strides = [1, 1]} : vector<8x128xf32> to vector<8x32xf32>
    %79 = vector.extract_strided_slice %76 {offsets = [0, 64], sizes = [8, 32], strides = [1, 1]} : vector<8x128xf32> to vector<8x32xf32>
    %80 = vector.extract_strided_slice %75 {offsets = [0, 96], sizes = [8, 32], strides = [1, 1]} : vector<8x128xf32> to vector<8x32xf32>
    %81 = arith.mulf %78, %64 : vector<8x32xf32>
    %82 = arith.mulf %77, %79 : vector<8x32xf32>
    %83 = arith.addf %81, %82 : vector<8x32xf32>
    %84 = math.tanh %83 : vector<8x32xf32>
    %85 = arith.mulf %80, %84 : vector<8x32xf32>
    %c24 = arith.constant 24 : index
    %c0_23 = arith.constant 0 : index
    %86 = vector.load %arg7[%c24, %c0_23] : memref<64x32xf32, #tpu.memory_space<vmem>>, vector<8x32xf32>
    tpu.vector_store %arg7[%c24, %c0_23], %85 {strides = array<i32>} : memref<64x32xf32, #tpu.memory_space<vmem>>, vector<8x32xf32>,
    %87 = vector.extract_strided_slice %8 {offsets = [32, 0], sizes = [8, 128], strides = [1, 1]} : vector<64x128xf32> to vector<8x128xf32>
    %cst_24 = arith.constant dense<0.000000e+00> : vector<8x128xf32>
    %88 = tpu.matmul %85, %1, %cst_24 {dimension_numbers = #tpu.dot_dimension_numbers<[1], [0], [0], [1], [0, 0, 1, 1], [], []>} : vector<8x32xf32>, vector<32x128xf32>, vector<8x128xf32> -> vector<8x128xf32>
    %89 = arith.addf %87, %88 : vector<8x128xf32>
    %90 = arith.negf %89 : vector<8x128xf32>
    %91 = math.exp %90 : vector<8x128xf32>
    %cst_25 = arith.constant 1.000000e+00 : f32
    %92 = vector.broadcast %cst_25 : f32 to vector<8x128xf32>
    %93 = arith.addf %92, %91 : vector<8x128xf32>
    %94 = arith.divf %92, %93 : vector<8x128xf32>
    %95 = math.tanh %89 : vector<8x128xf32>
    %96 = vector.extract_strided_slice %94 {offsets = [0, 0], sizes = [8, 32], strides = [1, 1]} : vector<8x128xf32> to vector<8x32xf32>
    %97 = vector.extract_strided_slice %94 {offsets = [0, 32], sizes = [8, 32], strides = [1, 1]} : vector<8x128xf32> to vector<8x32xf32>
    %98 = vector.extract_strided_slice %95 {offsets = [0, 64], sizes = [8, 32], strides = [1, 1]} : vector<8x128xf32> to vector<8x32xf32>
    %99 = vector.extract_strided_slice %94 {offsets = [0, 96], sizes = [8, 32], strides = [1, 1]} : vector<8x128xf32> to vector<8x32xf32>
    %100 = arith.mulf %97, %83 : vector<8x32xf32>
    %101 = arith.mulf %96, %98 : vector<8x32xf32>
    %102 = arith.addf %100, %101 : vector<8x32xf32>
    %103 = math.tanh %102 : vector<8x32xf32>
    %104 = arith.mulf %99, %103 : vector<8x32xf32>
    %c32 = arith.constant 32 : index
    %c0_26 = arith.constant 0 : index
    %105 = vector.load %arg7[%c32, %c0_26] : memref<64x32xf32, #tpu.memory_space<vmem>>, vector<8x32xf32>
    tpu.vector_store %arg7[%c32, %c0_26], %104 {strides = array<i32>} : memref<64x32xf32, #tpu.memory_space<vmem>>, vector<8x32xf32>,
    %106 = vector.extract_strided_slice %8 {offsets = [40, 0], sizes = [8, 128], strides = [1, 1]} : vector<64x128xf32> to vector<8x128xf32>
    %cst_27 = arith.constant dense<0.000000e+00> : vector<8x128xf32>
    %107 = tpu.matmul %104, %1, %cst_27 {dimension_numbers = #tpu.dot_dimension_numbers<[1], [0], [0], [1], [0, 0, 1, 1], [], []>} : vector<8x32xf32>, vector<32x128xf32>, vector<8x128xf32> -> vector<8x128xf32>
    %108 = arith.addf %106, %107 : vector<8x128xf32>
    %109 = arith.negf %108 : vector<8x128xf32>
    %110 = math.exp %109 : vector<8x128xf32>
    %cst_28 = arith.constant 1.000000e+00 : f32
    %111 = vector.broadcast %cst_28 : f32 to vector<8x128xf32>
    %112 = arith.addf %111, %110 : vector<8x128xf32>
    %113 = arith.divf %111, %112 : vector<8x128xf32>
    %114 = math.tanh %108 : vector<8x128xf32>
    %115 = vector.extract_strided_slice %113 {offsets = [0, 0], sizes = [8, 32], strides = [1, 1]} : vector<8x128xf32> to vector<8x32xf32>
    %116 = vector.extract_strided_slice %113 {offsets = [0, 32], sizes = [8, 32], strides = [1, 1]} : vector<8x128xf32> to vector<8x32xf32>
    %117 = vector.extract_strided_slice %114 {offsets = [0, 64], sizes = [8, 32], strides = [1, 1]} : vector<8x128xf32> to vector<8x32xf32>
    %118 = vector.extract_strided_slice %113 {offsets = [0, 96], sizes = [8, 32], strides = [1, 1]} : vector<8x128xf32> to vector<8x32xf32>
    %119 = arith.mulf %116, %102 : vector<8x32xf32>
    %120 = arith.mulf %115, %117 : vector<8x32xf32>
    %121 = arith.addf %119, %120 : vector<8x32xf32>
    %122 = math.tanh %121 : vector<8x32xf32>
    %123 = arith.mulf %118, %122 : vector<8x32xf32>
    %c40 = arith.constant 40 : index
    %c0_29 = arith.constant 0 : index
    %124 = vector.load %arg7[%c40, %c0_29] : memref<64x32xf32, #tpu.memory_space<vmem>>, vector<8x32xf32>
    tpu.vector_store %arg7[%c40, %c0_29], %123 {strides = array<i32>} : memref<64x32xf32, #tpu.memory_space<vmem>>, vector<8x32xf32>,
    %125 = vector.extract_strided_slice %8 {offsets = [48, 0], sizes = [8, 128], strides = [1, 1]} : vector<64x128xf32> to vector<8x128xf32>
    %cst_30 = arith.constant dense<0.000000e+00> : vector<8x128xf32>
    %126 = tpu.matmul %123, %1, %cst_30 {dimension_numbers = #tpu.dot_dimension_numbers<[1], [0], [0], [1], [0, 0, 1, 1], [], []>} : vector<8x32xf32>, vector<32x128xf32>, vector<8x128xf32> -> vector<8x128xf32>
    %127 = arith.addf %125, %126 : vector<8x128xf32>
    %128 = arith.negf %127 : vector<8x128xf32>
    %129 = math.exp %128 : vector<8x128xf32>
    %cst_31 = arith.constant 1.000000e+00 : f32
    %130 = vector.broadcast %cst_31 : f32 to vector<8x128xf32>
    %131 = arith.addf %130, %129 : vector<8x128xf32>
    %132 = arith.divf %130, %131 : vector<8x128xf32>
    %133 = math.tanh %127 : vector<8x128xf32>
    %134 = vector.extract_strided_slice %132 {offsets = [0, 0], sizes = [8, 32], strides = [1, 1]} : vector<8x128xf32> to vector<8x32xf32>
    %135 = vector.extract_strided_slice %132 {offsets = [0, 32], sizes = [8, 32], strides = [1, 1]} : vector<8x128xf32> to vector<8x32xf32>
    %136 = vector.extract_strided_slice %133 {offsets = [0, 64], sizes = [8, 32], strides = [1, 1]} : vector<8x128xf32> to vector<8x32xf32>
    %137 = vector.extract_strided_slice %132 {offsets = [0, 96], sizes = [8, 32], strides = [1, 1]} : vector<8x128xf32> to vector<8x32xf32>
    %138 = arith.mulf %135, %121 : vector<8x32xf32>
    %139 = arith.mulf %134, %136 : vector<8x32xf32>
    %140 = arith.addf %138, %139 : vector<8x32xf32>
    %141 = math.tanh %140 : vector<8x32xf32>
    %142 = arith.mulf %137, %141 : vector<8x32xf32>
    %c48 = arith.constant 48 : index
    %c0_32 = arith.constant 0 : index
    %143 = vector.load %arg7[%c48, %c0_32] : memref<64x32xf32, #tpu.memory_space<vmem>>, vector<8x32xf32>
    tpu.vector_store %arg7[%c48, %c0_32], %142 {strides = array<i32>} : memref<64x32xf32, #tpu.memory_space<vmem>>, vector<8x32xf32>,
    %144 = vector.extract_strided_slice %8 {offsets = [56, 0], sizes = [8, 128], strides = [1, 1]} : vector<64x128xf32> to vector<8x128xf32>
    %cst_33 = arith.constant dense<0.000000e+00> : vector<8x128xf32>
    %145 = tpu.matmul %142, %1, %cst_33 {dimension_numbers = #tpu.dot_dimension_numbers<[1], [0], [0], [1], [0, 0, 1, 1], [], []>} : vector<8x32xf32>, vector<32x128xf32>, vector<8x128xf32> -> vector<8x128xf32>
    %146 = arith.addf %144, %145 : vector<8x128xf32>
    %147 = arith.negf %146 : vector<8x128xf32>
    %148 = math.exp %147 : vector<8x128xf32>
    %cst_34 = arith.constant 1.000000e+00 : f32
    %149 = vector.broadcast %cst_34 : f32 to vector<8x128xf32>
    %150 = arith.addf %149, %148 : vector<8x128xf32>
    %151 = arith.divf %149, %150 : vector<8x128xf32>
    %152 = math.tanh %146 : vector<8x128xf32>
    %153 = vector.extract_strided_slice %151 {offsets = [0, 0], sizes = [8, 32], strides = [1, 1]} : vector<8x128xf32> to vector<8x32xf32>
    %154 = vector.extract_strided_slice %151 {offsets = [0, 32], sizes = [8, 32], strides = [1, 1]} : vector<8x128xf32> to vector<8x32xf32>
    %155 = vector.extract_strided_slice %152 {offsets = [0, 64], sizes = [8, 32], strides = [1, 1]} : vector<8x128xf32> to vector<8x32xf32>
    %156 = vector.extract_strided_slice %151 {offsets = [0, 96], sizes = [8, 32], strides = [1, 1]} : vector<8x128xf32> to vector<8x32xf32>
    %157 = arith.mulf %154, %140 : vector<8x32xf32>
    %158 = arith.mulf %153, %155 : vector<8x32xf32>
    %159 = arith.addf %157, %158 : vector<8x32xf32>
    %160 = math.tanh %159 : vector<8x32xf32>
    %161 = arith.mulf %156, %160 : vector<8x32xf32>
    %c56 = arith.constant 56 : index
    %c0_35 = arith.constant 0 : index
    %162 = vector.load %arg7[%c56, %c0_35] : memref<64x32xf32, #tpu.memory_space<vmem>>, vector<8x32xf32>
    tpu.vector_store %arg7[%c56, %c0_35], %161 {strides = array<i32>} : memref<64x32xf32, #tpu.memory_space<vmem>>, vector<8x32xf32>,
    %c1 = arith.constant 1 : index
    %c0_36 = arith.constant 0 : index
    %c0_37 = arith.constant 0 : index
    %163 = vector.load %arg3[%c1, %c0_36, %c0_37] : memref<2x32x128xf32, #tpu.memory_space<vmem>>, vector<1x32x128xf32>
    %164 = vector.shape_cast %163 : vector<1x32x128xf32> to vector<32x128xf32>
    %c1_38 = arith.constant 1 : index
    %c0_39 = arith.constant 0 : index
    %c0_40 = arith.constant 0 : index
    %165 = vector.load %arg4[%c1_38, %c0_39, %c0_40] : memref<2x1x128xf32, #tpu.memory_space<vmem>>, vector<1x1x128xf32>
    %166 = vector.shape_cast %165 : vector<1x1x128xf32> to vector<1x128xf32>
    %c0_41 = arith.constant 0 : index
    %c0_42 = arith.constant 0 : index
    %167 = vector.load %arg7[%c0_41, %c0_42] : memref<64x32xf32, #tpu.memory_space<vmem>>, vector<64x32xf32>
    %c0_43 = arith.constant 0 : index
    %c0_44 = arith.constant 0 : index
    %c0_45 = arith.constant 0 : index
    %168 = vector.load %arg2[%c0_43, %c0_44, %c0_45] : memref<1x32x128xf32, #tpu.memory_space<vmem>>, vector<1x32x128xf32>
    %169 = vector.shape_cast %168 : vector<1x32x128xf32> to vector<32x128xf32>
    %cst_46 = arith.constant dense<0.000000e+00> : vector<64x128xf32>
    %170 = tpu.matmul %167, %169, %cst_46 {dimension_numbers = #tpu.dot_dimension_numbers<[1], [0], [0], [1], [0, 0, 1, 1], [], []>} : vector<64x32xf32>, vector<32x128xf32>, vector<64x128xf32> -> vector<64x128xf32>
    %171 = vector.broadcast %166 : vector<1x128xf32> to vector<64x128xf32>
    %172 = arith.addf %170, %171 : vector<64x128xf32>
    %cst_47 = arith.constant 0.000000e+00 : f32
    %173 = vector.broadcast %cst_47 : f32 to vector<8x32xf32>
    %cst_48 = arith.constant 0.000000e+00 : f32
    %174 = vector.broadcast %cst_48 : f32 to vector<8x32xf32>
    %175 = vector.extract_strided_slice %172 {offsets = [0, 0], sizes = [8, 128], strides = [1, 1]} : vector<64x128xf32> to vector<8x128xf32>
    %cst_49 = arith.constant dense<0.000000e+00> : vector<8x128xf32>
    %176 = tpu.matmul %173, %164, %cst_49 {dimension_numbers = #tpu.dot_dimension_numbers<[1], [0], [0], [1], [0, 0, 1, 1], [], []>} : vector<8x32xf32>, vector<32x128xf32>, vector<8x128xf32> -> vector<8x128xf32>
    %177 = arith.addf %175, %176 : vector<8x128xf32>
    %178 = arith.negf %177 : vector<8x128xf32>
    %179 = math.exp %178 : vector<8x128xf32>
    %cst_50 = arith.constant 1.000000e+00 : f32
    %180 = vector.broadcast %cst_50 : f32 to vector<8x128xf32>
    %181 = arith.addf %180, %179 : vector<8x128xf32>
    %182 = arith.divf %180, %181 : vector<8x128xf32>
    %183 = math.tanh %177 : vector<8x128xf32>
    %184 = vector.extract_strided_slice %182 {offsets = [0, 0], sizes = [8, 32], strides = [1, 1]} : vector<8x128xf32> to vector<8x32xf32>
    %185 = vector.extract_strided_slice %182 {offsets = [0, 32], sizes = [8, 32], strides = [1, 1]} : vector<8x128xf32> to vector<8x32xf32>
    %186 = vector.extract_strided_slice %183 {offsets = [0, 64], sizes = [8, 32], strides = [1, 1]} : vector<8x128xf32> to vector<8x32xf32>
    %187 = vector.extract_strided_slice %182 {offsets = [0, 96], sizes = [8, 32], strides = [1, 1]} : vector<8x128xf32> to vector<8x32xf32>
    %188 = arith.mulf %185, %174 : vector<8x32xf32>
    %189 = arith.mulf %184, %186 : vector<8x32xf32>
    %190 = arith.addf %188, %189 : vector<8x32xf32>
    %191 = math.tanh %190 : vector<8x32xf32>
    %192 = arith.mulf %187, %191 : vector<8x32xf32>
    %193 = vector.extract_strided_slice %172 {offsets = [8, 0], sizes = [8, 128], strides = [1, 1]} : vector<64x128xf32> to vector<8x128xf32>
    %cst_51 = arith.constant dense<0.000000e+00> : vector<8x128xf32>
    %194 = tpu.matmul %192, %164, %cst_51 {dimension_numbers = #tpu.dot_dimension_numbers<[1], [0], [0], [1], [0, 0, 1, 1], [], []>} : vector<8x32xf32>, vector<32x128xf32>, vector<8x128xf32> -> vector<8x128xf32>
    %195 = arith.addf %193, %194 : vector<8x128xf32>
    %196 = arith.negf %195 : vector<8x128xf32>
    %197 = math.exp %196 : vector<8x128xf32>
    %cst_52 = arith.constant 1.000000e+00 : f32
    %198 = vector.broadcast %cst_52 : f32 to vector<8x128xf32>
    %199 = arith.addf %198, %197 : vector<8x128xf32>
    %200 = arith.divf %198, %199 : vector<8x128xf32>
    %201 = math.tanh %195 : vector<8x128xf32>
    %202 = vector.extract_strided_slice %200 {offsets = [0, 0], sizes = [8, 32], strides = [1, 1]} : vector<8x128xf32> to vector<8x32xf32>
    %203 = vector.extract_strided_slice %200 {offsets = [0, 32], sizes = [8, 32], strides = [1, 1]} : vector<8x128xf32> to vector<8x32xf32>
    %204 = vector.extract_strided_slice %201 {offsets = [0, 64], sizes = [8, 32], strides = [1, 1]} : vector<8x128xf32> to vector<8x32xf32>
    %205 = vector.extract_strided_slice %200 {offsets = [0, 96], sizes = [8, 32], strides = [1, 1]} : vector<8x128xf32> to vector<8x32xf32>
    %206 = arith.mulf %203, %190 : vector<8x32xf32>
    %207 = arith.mulf %202, %204 : vector<8x32xf32>
    %208 = arith.addf %206, %207 : vector<8x32xf32>
    %209 = math.tanh %208 : vector<8x32xf32>
    %210 = arith.mulf %205, %209 : vector<8x32xf32>
    %211 = vector.extract_strided_slice %172 {offsets = [16, 0], sizes = [8, 128], strides = [1, 1]} : vector<64x128xf32> to vector<8x128xf32>
    %cst_53 = arith.constant dense<0.000000e+00> : vector<8x128xf32>
    %212 = tpu.matmul %210, %164, %cst_53 {dimension_numbers = #tpu.dot_dimension_numbers<[1], [0], [0], [1], [0, 0, 1, 1], [], []>} : vector<8x32xf32>, vector<32x128xf32>, vector<8x128xf32> -> vector<8x128xf32>
    %213 = arith.addf %211, %212 : vector<8x128xf32>
    %214 = arith.negf %213 : vector<8x128xf32>
    %215 = math.exp %214 : vector<8x128xf32>
    %cst_54 = arith.constant 1.000000e+00 : f32
    %216 = vector.broadcast %cst_54 : f32 to vector<8x128xf32>
    %217 = arith.addf %216, %215 : vector<8x128xf32>
    %218 = arith.divf %216, %217 : vector<8x128xf32>
    %219 = math.tanh %213 : vector<8x128xf32>
    %220 = vector.extract_strided_slice %218 {offsets = [0, 0], sizes = [8, 32], strides = [1, 1]} : vector<8x128xf32> to vector<8x32xf32>
    %221 = vector.extract_strided_slice %218 {offsets = [0, 32], sizes = [8, 32], strides = [1, 1]} : vector<8x128xf32> to vector<8x32xf32>
    %222 = vector.extract_strided_slice %219 {offsets = [0, 64], sizes = [8, 32], strides = [1, 1]} : vector<8x128xf32> to vector<8x32xf32>
    %223 = vector.extract_strided_slice %218 {offsets = [0, 96], sizes = [8, 32], strides = [1, 1]} : vector<8x128xf32> to vector<8x32xf32>
    %224 = arith.mulf %221, %208 : vector<8x32xf32>
    %225 = arith.mulf %220, %222 : vector<8x32xf32>
    %226 = arith.addf %224, %225 : vector<8x32xf32>
    %227 = math.tanh %226 : vector<8x32xf32>
    %228 = arith.mulf %223, %227 : vector<8x32xf32>
    %229 = vector.extract_strided_slice %172 {offsets = [24, 0], sizes = [8, 128], strides = [1, 1]} : vector<64x128xf32> to vector<8x128xf32>
    %cst_55 = arith.constant dense<0.000000e+00> : vector<8x128xf32>
    %230 = tpu.matmul %228, %164, %cst_55 {dimension_numbers = #tpu.dot_dimension_numbers<[1], [0], [0], [1], [0, 0, 1, 1], [], []>} : vector<8x32xf32>, vector<32x128xf32>, vector<8x128xf32> -> vector<8x128xf32>
    %231 = arith.addf %229, %230 : vector<8x128xf32>
    %232 = arith.negf %231 : vector<8x128xf32>
    %233 = math.exp %232 : vector<8x128xf32>
    %cst_56 = arith.constant 1.000000e+00 : f32
    %234 = vector.broadcast %cst_56 : f32 to vector<8x128xf32>
    %235 = arith.addf %234, %233 : vector<8x128xf32>
    %236 = arith.divf %234, %235 : vector<8x128xf32>
    %237 = math.tanh %231 : vector<8x128xf32>
    %238 = vector.extract_strided_slice %236 {offsets = [0, 0], sizes = [8, 32], strides = [1, 1]} : vector<8x128xf32> to vector<8x32xf32>
    %239 = vector.extract_strided_slice %236 {offsets = [0, 32], sizes = [8, 32], strides = [1, 1]} : vector<8x128xf32> to vector<8x32xf32>
    %240 = vector.extract_strided_slice %237 {offsets = [0, 64], sizes = [8, 32], strides = [1, 1]} : vector<8x128xf32> to vector<8x32xf32>
    %241 = vector.extract_strided_slice %236 {offsets = [0, 96], sizes = [8, 32], strides = [1, 1]} : vector<8x128xf32> to vector<8x32xf32>
    %242 = arith.mulf %239, %226 : vector<8x32xf32>
    %243 = arith.mulf %238, %240 : vector<8x32xf32>
    %244 = arith.addf %242, %243 : vector<8x32xf32>
    %245 = math.tanh %244 : vector<8x32xf32>
    %246 = arith.mulf %241, %245 : vector<8x32xf32>
    %247 = vector.extract_strided_slice %172 {offsets = [32, 0], sizes = [8, 128], strides = [1, 1]} : vector<64x128xf32> to vector<8x128xf32>
    %cst_57 = arith.constant dense<0.000000e+00> : vector<8x128xf32>
    %248 = tpu.matmul %246, %164, %cst_57 {dimension_numbers = #tpu.dot_dimension_numbers<[1], [0], [0], [1], [0, 0, 1, 1], [], []>} : vector<8x32xf32>, vector<32x128xf32>, vector<8x128xf32> -> vector<8x128xf32>
    %249 = arith.addf %247, %248 : vector<8x128xf32>
    %250 = arith.negf %249 : vector<8x128xf32>
    %251 = math.exp %250 : vector<8x128xf32>
    %cst_58 = arith.constant 1.000000e+00 : f32
    %252 = vector.broadcast %cst_58 : f32 to vector<8x128xf32>
    %253 = arith.addf %252, %251 : vector<8x128xf32>
    %254 = arith.divf %252, %253 : vector<8x128xf32>
    %255 = math.tanh %249 : vector<8x128xf32>
    %256 = vector.extract_strided_slice %254 {offsets = [0, 0], sizes = [8, 32], strides = [1, 1]} : vector<8x128xf32> to vector<8x32xf32>
    %257 = vector.extract_strided_slice %254 {offsets = [0, 32], sizes = [8, 32], strides = [1, 1]} : vector<8x128xf32> to vector<8x32xf32>
    %258 = vector.extract_strided_slice %255 {offsets = [0, 64], sizes = [8, 32], strides = [1, 1]} : vector<8x128xf32> to vector<8x32xf32>
    %259 = vector.extract_strided_slice %254 {offsets = [0, 96], sizes = [8, 32], strides = [1, 1]} : vector<8x128xf32> to vector<8x32xf32>
    %260 = arith.mulf %257, %244 : vector<8x32xf32>
    %261 = arith.mulf %256, %258 : vector<8x32xf32>
    %262 = arith.addf %260, %261 : vector<8x32xf32>
    %263 = math.tanh %262 : vector<8x32xf32>
    %264 = arith.mulf %259, %263 : vector<8x32xf32>
    %265 = vector.extract_strided_slice %172 {offsets = [40, 0], sizes = [8, 128], strides = [1, 1]} : vector<64x128xf32> to vector<8x128xf32>
    %cst_59 = arith.constant dense<0.000000e+00> : vector<8x128xf32>
    %266 = tpu.matmul %264, %164, %cst_59 {dimension_numbers = #tpu.dot_dimension_numbers<[1], [0], [0], [1], [0, 0, 1, 1], [], []>} : vector<8x32xf32>, vector<32x128xf32>, vector<8x128xf32> -> vector<8x128xf32>
    %267 = arith.addf %265, %266 : vector<8x128xf32>
    %268 = arith.negf %267 : vector<8x128xf32>
    %269 = math.exp %268 : vector<8x128xf32>
    %cst_60 = arith.constant 1.000000e+00 : f32
    %270 = vector.broadcast %cst_60 : f32 to vector<8x128xf32>
    %271 = arith.addf %270, %269 : vector<8x128xf32>
    %272 = arith.divf %270, %271 : vector<8x128xf32>
    %273 = math.tanh %267 : vector<8x128xf32>
    %274 = vector.extract_strided_slice %272 {offsets = [0, 0], sizes = [8, 32], strides = [1, 1]} : vector<8x128xf32> to vector<8x32xf32>
    %275 = vector.extract_strided_slice %272 {offsets = [0, 32], sizes = [8, 32], strides = [1, 1]} : vector<8x128xf32> to vector<8x32xf32>
    %276 = vector.extract_strided_slice %273 {offsets = [0, 64], sizes = [8, 32], strides = [1, 1]} : vector<8x128xf32> to vector<8x32xf32>
    %277 = vector.extract_strided_slice %272 {offsets = [0, 96], sizes = [8, 32], strides = [1, 1]} : vector<8x128xf32> to vector<8x32xf32>
    %278 = arith.mulf %275, %262 : vector<8x32xf32>
    %279 = arith.mulf %274, %276 : vector<8x32xf32>
    %280 = arith.addf %278, %279 : vector<8x32xf32>
    %281 = math.tanh %280 : vector<8x32xf32>
    %282 = arith.mulf %277, %281 : vector<8x32xf32>
    %283 = vector.extract_strided_slice %172 {offsets = [48, 0], sizes = [8, 128], strides = [1, 1]} : vector<64x128xf32> to vector<8x128xf32>
    %cst_61 = arith.constant dense<0.000000e+00> : vector<8x128xf32>
    %284 = tpu.matmul %282, %164, %cst_61 {dimension_numbers = #tpu.dot_dimension_numbers<[1], [0], [0], [1], [0, 0, 1, 1], [], []>} : vector<8x32xf32>, vector<32x128xf32>, vector<8x128xf32> -> vector<8x128xf32>
    %285 = arith.addf %283, %284 : vector<8x128xf32>
    %286 = arith.negf %285 : vector<8x128xf32>
    %287 = math.exp %286 : vector<8x128xf32>
    %cst_62 = arith.constant 1.000000e+00 : f32
    %288 = vector.broadcast %cst_62 : f32 to vector<8x128xf32>
    %289 = arith.addf %288, %287 : vector<8x128xf32>
    %290 = arith.divf %288, %289 : vector<8x128xf32>
    %291 = math.tanh %285 : vector<8x128xf32>
    %292 = vector.extract_strided_slice %290 {offsets = [0, 0], sizes = [8, 32], strides = [1, 1]} : vector<8x128xf32> to vector<8x32xf32>
    %293 = vector.extract_strided_slice %290 {offsets = [0, 32], sizes = [8, 32], strides = [1, 1]} : vector<8x128xf32> to vector<8x32xf32>
    %294 = vector.extract_strided_slice %291 {offsets = [0, 64], sizes = [8, 32], strides = [1, 1]} : vector<8x128xf32> to vector<8x32xf32>
    %295 = vector.extract_strided_slice %290 {offsets = [0, 96], sizes = [8, 32], strides = [1, 1]} : vector<8x128xf32> to vector<8x32xf32>
    %296 = arith.mulf %293, %280 : vector<8x32xf32>
    %297 = arith.mulf %292, %294 : vector<8x32xf32>
    %298 = arith.addf %296, %297 : vector<8x32xf32>
    %299 = math.tanh %298 : vector<8x32xf32>
    %300 = arith.mulf %295, %299 : vector<8x32xf32>
    %301 = vector.extract_strided_slice %172 {offsets = [56, 0], sizes = [8, 128], strides = [1, 1]} : vector<64x128xf32> to vector<8x128xf32>
    %cst_63 = arith.constant dense<0.000000e+00> : vector<8x128xf32>
    %302 = tpu.matmul %300, %164, %cst_63 {dimension_numbers = #tpu.dot_dimension_numbers<[1], [0], [0], [1], [0, 0, 1, 1], [], []>} : vector<8x32xf32>, vector<32x128xf32>, vector<8x128xf32> -> vector<8x128xf32>
    %303 = arith.addf %301, %302 : vector<8x128xf32>
    %304 = arith.negf %303 : vector<8x128xf32>
    %305 = math.exp %304 : vector<8x128xf32>
    %cst_64 = arith.constant 1.000000e+00 : f32
    %306 = vector.broadcast %cst_64 : f32 to vector<8x128xf32>
    %307 = arith.addf %306, %305 : vector<8x128xf32>
    %308 = arith.divf %306, %307 : vector<8x128xf32>
    %309 = math.tanh %303 : vector<8x128xf32>
    %310 = vector.extract_strided_slice %308 {offsets = [0, 0], sizes = [8, 32], strides = [1, 1]} : vector<8x128xf32> to vector<8x32xf32>
    %311 = vector.extract_strided_slice %308 {offsets = [0, 32], sizes = [8, 32], strides = [1, 1]} : vector<8x128xf32> to vector<8x32xf32>
    %312 = vector.extract_strided_slice %309 {offsets = [0, 64], sizes = [8, 32], strides = [1, 1]} : vector<8x128xf32> to vector<8x32xf32>
    %313 = vector.extract_strided_slice %308 {offsets = [0, 96], sizes = [8, 32], strides = [1, 1]} : vector<8x128xf32> to vector<8x32xf32>
    %314 = arith.mulf %311, %298 : vector<8x32xf32>
    %315 = arith.mulf %310, %312 : vector<8x32xf32>
    %316 = arith.addf %314, %315 : vector<8x32xf32>
    %317 = math.tanh %316 : vector<8x32xf32>
    %318 = arith.mulf %313, %317 : vector<8x32xf32>
    %c0_65 = arith.constant 0 : index
    %c0_66 = arith.constant 0 : index
    %319 = vector.load %arg5[%c0_65, %c0_66] : memref<2x32xf32, #tpu.memory_space<vmem>>, vector<1x32xf32>
    %320 = vector.broadcast %319 : vector<1x32xf32> to vector<8x32xf32>
    %321 = arith.mulf %318, %320 : vector<8x32xf32>
    %cst_67 = arith.constant dense<0.000000e+00> : vector<8xf32>
    %322 = vector.multi_reduction <add>, %321, %cst_67 [1] : vector<8x32xf32> to vector<8xf32>
    %323 = vector.shape_cast %322 : vector<8xf32> to vector<8x1xf32>
    %c1_68 = arith.constant 1 : index
    %c0_69 = arith.constant 0 : index
    %324 = vector.load %arg5[%c1_68, %c0_69] : memref<2x32xf32, #tpu.memory_space<vmem>>, vector<1x1xf32>
    %325 = vector.broadcast %324 : vector<1x1xf32> to vector<8x1xf32>
    %326 = arith.addf %323, %325 : vector<8x1xf32>
    %c0_70 = arith.constant 0 : index
    %c0_71 = arith.constant 0 : index
    %327 = vector.load %arg6[%c0_70, %c0_71] : memref<8x1xf32, #tpu.memory_space<vmem>>, vector<8x1xf32>
    tpu.vector_store %arg6[%c0_70, %c0_71], %326 {strides = array<i32>} : memref<8x1xf32, #tpu.memory_space<vmem>>, vector<8x1xf32>,
    return
  }
}

</mosaic_0001>

<bundles_post_ra>
// kernel: tpu_custom_call.1
= control target key start
LH: loop header
LB: loop body
LE: loop exit
PB: predicated region body
PF: predicated region fallthrough
CT: control target
= control target key end

     0   :  { %11 = vsyncpa [#allocation4], 0  ;;  %s1476_s24 = smov [#allocation3]   ;;  %s1477_s26 = smov 128   ;;  %s1809_s0 = inlined_call_operand.vmem [shape: f32[64,4], index: 0, kind: input, shape index: {}]   ;;  %s1810_s1 = inlined_call_operand.vmem [shape: f32[4,128], index: 1, kind: input, shape index: {}]   ;;  %s1811_s2 = inlined_call_operand.hbm [shape: f32[1,32,128], index: 2, kind: input, shape index: {}]   ;;  %s1812_s3 = inlined_call_operand.vmem [shape: f32[2,32,128], index: 3, kind: input, shape index: {}]   ;;  %s1813_s4 = inlined_call_operand.vmem [shape: f32[2,1,128], index: 4, kind: input, shape index: {}]   ;;  %s1814_s5 = inlined_call_operand.vmem [shape: f32[2,32], index: 5, kind: input, shape index: {}]   ;;  %s1815_s6 = inlined_call_operand.vmem [shape: f32[8,1], index: 6, kind: output, shape index: {}]  }
   0x1   :  { %s20_s23 = sshll.u32 %s1811_s2, 4  ;;  %s22_s25 = sshll.u32 %s1476_s24, 4  ;;  %s21_s23 = int_to_ptr.hbm [resolvable:$true] %s20_s23  ;;  %s23_s25 = int_to_ptr.vmem [resolvable:$true] %s22_s25 }
   0x2   :  { %s1478_s27 = smov 8  }
   0x3   :  { %28 = dma.hbm_to_vmem [thread:$0]  %s21_s23, 512, %s23_s25, [#allocation4], %s1477_s26, %s1477_s26, %s1478_s27  }
   0x4   :  { %1474 = dma.done.wait [#allocation4], 512  }
   0x5   :  { %1475 = vsyncadd [#allocation4], 4294966784  ;;  %vm81_vm0 = vcmask 1043456   ;;  %vm56_vm1 = vcmask 31744   ;;  %v1524_v0 = vld [vmem:[%s1812_s3 + $0x18] sm:$0xff]  ;;  %v1529_v1 = vld [vmem:[%s1812_s3 + $0x10] sm:$0xff] }
   0x6   :  { %v52_v2 = vld [vmem:[%s1810_s1] sm:$0xf]  ;;  %142 = vmatpush.msra.mxu1 %v1524_v0  ;;  %v1541_v4 = vld [vmem:[%s1812_s3 + $0x8] sm:$0xff]  ;;  %207 = vmatpush.msra.mxu2 %v1524_v0  ;;  %v1479_v6 = vmov 0.0   ;;  %s1480_s16 = smov 64   ;;  %s1481_s17 = smov 32  }
   0x7   :  { %1258 = vmatpush.msk.msra.mxu0 %vm81_vm0, %v52_v2  ;;  %v44_v3 = vld [vmem:[%s1809_s0] sm:$0xff]  ;;  %v666_v34 = vld [vmem:[#allocation3 + $0x18] sm:$0xff]  ;;  %v665_v35 = vld [vmem:[#allocation3 + $0x10] sm:$0xff]  ;;  %vm126_vm6 = vcmask 261120   ;;  %s1482_s19 = smov 96  }
   0x8   :  { %1259 = vmatmul.msk.f32.vlgmr.msra.gmra.mxu0 %vm56_vm1, %v44_v3  ;;  %143 = vmatpush.msra.mxu1 %v1529_v1  ;;  %v1549_v5 = vld [vmem:[%s1812_s3] sm:$0xff]  ;;  %v45_v36 = vld [vmem:[%s1809_s0 + $0x8] sm:$0xff]  ;;  %v46_v3 = vld [vmem:[%s1809_s0 + $0x10] sm:$0xff] }
   0x9   :  { %208 = vmatpush.msra.mxu2 %v1529_v1  ;;  %v1572_v7 = vld [vmem:[%s1813_s4] ss:$0 sm:$0xff]  ;;  %706 = vmatpush.msra.mxu3 %v666_v34  ;;  %v664_v37 = vld [vmem:[#allocation3 + $0x8] sm:$0xff] }
   0xa   :  { %144 = vmatpush.msra.mxu1 %v1541_v4  ;;  %v663_v38 = vld [vmem:[#allocation3] sm:$0xff] }
   0xb   :  { %209 = vmatpush.msra.mxu2 %v1541_v4  ;;  %707 = vmatpush.msra.mxu3 %v665_v35 }
   0xc   :  { %145 = vmatpush.msra.mxu1 %v1549_v5 }
   0xd   :  { %146 = vmatmul.f32.vlgmr.msra.gmra.mxu1 %v1479_v6  ;;  %210 = vmatpush.msra.mxu2 %v1549_v5 }
   0xe   :  { %272 = vmatpush.msrb.mxu1 %v1524_v0  ;;  %708 = vmatpush.msra.mxu3 %v664_v37 }
   0xf   :  { %402 = vmatpush.msrb.mxu2 %v1524_v0 }
  0x10   :  { %273 = vmatpush.msrb.mxu1 %v1529_v1  ;;  %1260 = vmatmul.msk.f32.gmra.mxu0 %vm56_vm1, %v45_v36  ;;  %v47_v36 = vld [vmem:[%s1809_s0 + $0x18] sm:$0xff] }
  0x11   :  { %403 = vmatpush.msrb.mxu2 %v1529_v1  ;;  %709 = vmatpush.msra.mxu3 %v663_v38 }
  0x12   :  { %274 = vmatpush.msrb.mxu1 %v1541_v4 }
  0x13   :  { %404 = vmatpush.msrb.mxu2 %v1541_v4 }
  0x14   :  { %275 = vmatpush.msrb.mxu1 %v1549_v5 }
  0x15   :  { %405 = vmatpush.msrb.mxu2 %v1549_v5 }
  0x16   :  { %337 = vmatpush.msra.mxu1 %v1524_v0 }
  0x18   :  { %338 = vmatpush.msra.mxu1 %v1529_v1  ;;  %1261 = vmatmul.msk.f32.gmra.mxu0 %vm56_vm1, %v46_v3 }
  0x1a   :  { %339 = vmatpush.msra.mxu1 %v1541_v4 }
  0x1c   :  { %340 = vmatpush.msra.mxu1 %v1549_v5 }
  0x20   :  { %1262 = vmatmul.msk.f32.gmra.mxu0 %vm56_vm1, %v47_v36 }
  0x85   :  { %v102_v8 = vpop.f32.mrf.mxu0 }
  0x86   :  { %v103_v9 = vadd.f32 %v1572_v7, %v102_v8 }
  0x8a   :  { %v147_v10 = vpop.f32.mrf.mxu1 }
  0x8b   :  { %v150_v11 = vadd.f32 %v147_v10, %v103_v9 }
  0x8d   :  { %1321 = vtanh.f32 %v150_v11  ;;  %v1267_v13 = vmul.f32 -1.442695, %v150_v11  ;;  %v105_v41 = vpop.f32.mrf.mxu0 }
  0x8e   :  { %v106_v42 = vadd.f32 %v1572_v7, %v105_v41 }
  0x8f   :  { %1323 = vpow2.f32 %v1267_v13 }
  0x93   :  { %v1322_v12 = vpop.eup %1321 }
  0x94   :  { %173 = vrot.lane.b32.xlu0 %v1322_v12, %s1480_s16 }
  0x95   :  { %v1324_v14 = vpop.eup %1323  ;;  %v108_v12 = vpop.f32.mrf.mxu0 }
  0x96   :  { %v154_v15 = vadd.f32 1.0, %v1324_v14  ;;  %v109_v13 = vadd.f32 %v1572_v7, %v108_v12 }
  0x98   :  { %1325 = vrcp.f32 %v154_v15  ;;  %v166_v21 = vand.u32 2147483648, %v154_v15  ;;  %vm160_vm3 = vweird.f32 %v154_v15  ;;  %v164_v22 = vand.u32 2147483647, %v154_v15 }
  0x9a   :  { %v167_v24 = vor.u32 1.1754944e-38, %v166_v21  ;;  %vm165_vm5 = vcmp.eq.f32.partialorder %v164_v22, 8.507059e+37 }
  0x9d   :  { %v111_v41 = vpop.f32.mrf.mxu0 }
  0x9e   :  { %v1326_v16 = vpop.eup %1325 }
  0x9f   :  { %v156_v17 = vmul.f32 %v1326_v16, %v154_v15  ;;  %vm161_vm2 = vweird.f32 %v1326_v16 }
  0xa0   :  { %vm162_vm4 = vmor %vm160_vm3, %vm161_vm2 }
  0xa1   :  { %v157_v18 = vsub.f32 1.0, %v156_v17 }
  0xa3   :  { %v158_v19 = vmul.f32 %v1326_v16, %v157_v18 }
  0xa5   :  { %v159_v20 = vadd.f32 %v1326_v16, %v158_v19 }
  0xa7   :  { %v163_v23 = vsel %vm162_vm4, %v1326_v16, %v159_v20 }
  0xa8   :  { %v168_v26 = vsel %vm165_vm5, %v167_v24, %v163_v23 }
  0xa9   :  { %v171_v28 = vmul.f32 0.0, %v168_v26 }
 0x106   :  { %v174_v25 = vpop.permute.xlu0 %173 }
 0x107   :  { %v176_v27 = vmul.f32 %v174_v25, %v168_v26 }
 0x109   :  { %178 = vrot.lane.b32.xlu0 %v176_v27, %s1481_s17 }
 0x17b   :  { %v179_v29 = vpop.permute.xlu0 %178 }
 0x17c   :  { %v181_v30 = vadd.f32 %v179_v29, %v171_v28 }
 0x17e   :  { %1327 = vtanh.f32 %v181_v30 }
 0x184   :  { %v1328_v31 = vpop.eup %1327 }
 0x185   :  { %184 = vrot.lane.b32.xlu1 %v1328_v31, %s1480_s16 }
 0x1f7   :  { %v185_v32 = vpop.permute.xlu1 %184 }
 0x1f8   :  { %v187_v33 = vmul.f32 %v185_v32, %v168_v26 }
 0x1fa   :  { %189 = vrot.lane.b32.xlu1 %v187_v33, %s1481_s17 }
 0x26c   :  { %v190_v39 = vpop.permute.xlu1 %189 }
 0x26d   :  { %192 = vst.msk [vmem:[#allocation2] sm:$0xff] %vm126_vm6, %v190_v39  ;;  %1268 = vmatmul.msk.f32.vlgmr.msra.gmra.mxu2 %vm126_vm6, %v190_v39 }
 0x26e   :  { %467 = vmatpush.msra.mxu2 %v1524_v0 }
 0x270   :  { %468 = vmatpush.msra.mxu2 %v1529_v1 }
 0x272   :  { %469 = vmatpush.msra.mxu2 %v1541_v4 }
 0x274   :  { %v655_v40 = vld [vmem:[#allocation2] sm:$0xff]  ;;  %470 = vmatpush.msra.mxu2 %v1549_v5 }
 0x275   :  { %1287 = vmatmul.msk.f32.vlgmr.msra.gmra.mxu3 %vm126_vm6, %v655_v40 }
 0x2f0   :  { %v212_v43 = vpop.f32.mrf.mxu2 }
 0x2f1   :  { %v215_v44 = vadd.f32 %v212_v43, %v106_v42  ;;  %v112_v42 = vadd.f32 %v1572_v7, %v111_v41 }
 0x2f3   :  { %1329 = vtanh.f32 %v215_v44  ;;  %v1269_v46 = vmul.f32 -1.442695, %v215_v44 }
 0x2f5   :  { %1331 = vpow2.f32 %v1269_v46 }
 0x2f9   :  { %v1330_v45 = vpop.eup %1329 }
 0x2fa   :  { %238 = vrot.lane.b32.xlu2 %v1330_v45, %s1480_s16 }
 0x2fb   :  { %v1332_v47 = vpop.eup %1331 }
 0x2fc   :  { %v219_v48 = vadd.f32 1.0, %v1332_v47 }
 0x2fe   :  { %1333 = vrcp.f32 %v219_v48  ;;  %v231_v54 = vand.u32 2147483648, %v219_v48  ;;  %vm225_vm8 = vweird.f32 %v219_v48  ;;  %v229_v55 = vand.u32 2147483647, %v219_v48 }
 0x300   :  { %v232_v57 = vor.u32 1.1754944e-38, %v231_v54  ;;  %vm230_vm10 = vcmp.eq.f32.partialorder %v229_v55, 8.507059e+37 }
 0x304   :  { %v1334_v49 = vpop.eup %1333 }
 0x305   :  { %v221_v50 = vmul.f32 %v1334_v49, %v219_v48  ;;  %vm226_vm7 = vweird.f32 %v1334_v49 }
 0x306   :  { %vm227_vm9 = vmor %vm225_vm8, %vm226_vm7 }
 0x307   :  { %v222_v51 = vsub.f32 1.0, %v221_v50 }
 0x309   :  { %v223_v52 = vmul.f32 %v1334_v49, %v222_v51 }
 0x30b   :  { %v224_v53 = vadd.f32 %v1334_v49, %v223_v52 }
 0x30d   :  { %v228_v56 = vsel %vm227_vm9, %v1334_v49, %v224_v53 }
 0x30e   :  { %v233_v59 = vsel %vm230_vm10, %v232_v57, %v228_v56 }
 0x30f   :  { %v236_v61 = vmul.f32 %v233_v59, %v181_v30 }
 0x354   :  { %v239_v58 = vpop.permute.xlu2 %238 }
 0x355   :  { %v241_v60 = vmul.f32 %v239_v58, %v233_v59 }
 0x357   :  { %243 = vrot.lane.b32.xlu2 %v241_v60, %s1481_s17 }
 0x3b1   :  { %v244_v62 = vpop.permute.xlu2 %243 }
 0x3b2   :  { %v246_v63 = vadd.f32 %v244_v62, %v236_v61 }
 0x3b4   :  { %1335 = vtanh.f32 %v246_v63 }
 0x3ba   :  { %v1336_v2 = vpop.eup %1335 }
 0x3bb   :  { %249 = vrot.lane.b32.xlu0 %v1336_v2, %s1480_s16 }
 0x42d   :  { %v250_v8 = vpop.permute.xlu0 %249 }
 0x42e   :  { %v252_v9 = vmul.f32 %v250_v8, %v233_v59 }
 0x430   :  { %254 = vrot.lane.b32.xlu1 %v252_v9, %s1481_s17  ;;  %v48_v9 = vld [vmem:[%s1809_s0 + $0x20] sm:$0xff] }
 0x431   :  { %1263 = vmatmul.msk.f32.gmra.mxu0 %vm56_vm1, %v48_v9  ;;  %v1680_v9 = vld [vmem:[%s1812_s3 + $0x20] sm:$0xff] }
 0x4a2   :  { %v255_v10 = vpop.permute.xlu1 %254 }
 0x4a3   :  { %257 = vst.msk [vmem:[#allocation2 + $0x8] sm:$0xff] %vm126_vm6, %v255_v10  ;;  %1270 = vmatmul.msk.f32.vlgmr.msrb.gmra.mxu1 %vm126_vm6, %v255_v10 }
 0x4a4   :  { %532 = vmatpush.msrb.mxu1 %v1524_v0 }
 0x4a6   :  { %533 = vmatpush.msrb.mxu1 %v1529_v1 }
 0x4a8   :  { %534 = vmatpush.msrb.mxu1 %v1541_v4 }
 0x4aa   :  { %v656_v11 = vld [vmem:[#allocation2 + $0x8] sm:$0xff]  ;;  %535 = vmatpush.msrb.mxu1 %v1549_v5 }
 0x4ab   :  { %1288 = vmatmul.msk.f32.gmra.mxu3 %vm126_vm6, %v656_v11 }
 0x4ae   :  { %v114_v12 = vpop.f32.mrf.mxu0 }
 0x520   :  { %v277_v14 = vpop.f32.mrf.mxu1 }
 0x521   :  { %v280_v15 = vadd.f32 %v277_v14, %v109_v13  ;;  %v115_v13 = vadd.f32 %v1572_v7, %v114_v12 }
 0x523   :  { %1337 = vtanh.f32 %v280_v15  ;;  %v1271_v17 = vmul.f32 -1.442695, %v280_v15 }
 0x525   :  { %1339 = vpow2.f32 %v1271_v17 }
 0x529   :  { %v1338_v16 = vpop.eup %1337 }
 0x52a   :  { %303 = vrot.lane.b32.xlu2 %v1338_v16, %s1480_s16 }
 0x52b   :  { %v1340_v18 = vpop.eup %1339 }
 0x52c   :  { %v284_v19 = vadd.f32 1.0, %v1340_v18 }
 0x52e   :  { %1341 = vrcp.f32 %v284_v19  ;;  %v296_v25 = vand.u32 2147483648, %v284_v19  ;;  %vm290_vm12 = vweird.f32 %v284_v19  ;;  %v294_v26 = vand.u32 2147483647, %v284_v19 }
 0x530   :  { %v297_v28 = vor.u32 1.1754944e-38, %v296_v25  ;;  %vm295_vm14 = vcmp.eq.f32.partialorder %v294_v26, 8.507059e+37 }
 0x534   :  { %v1342_v20 = vpop.eup %1341 }
 0x535   :  { %v286_v21 = vmul.f32 %v1342_v20, %v284_v19  ;;  %vm291_vm11 = vweird.f32 %v1342_v20 }
 0x536   :  { %vm292_vm13 = vmor %vm290_vm12, %vm291_vm11 }
 0x537   :  { %v287_v22 = vsub.f32 1.0, %v286_v21 }
 0x539   :  { %v288_v23 = vmul.f32 %v1342_v20, %v287_v22 }
 0x53b   :  { %v289_v24 = vadd.f32 %v1342_v20, %v288_v23 }
 0x53d   :  { %v293_v27 = vsel %vm292_vm13, %v1342_v20, %v289_v24 }
 0x53e   :  { %v298_v30 = vsel %vm295_vm14, %v297_v28, %v293_v27 }
 0x53f   :  { %v301_v32 = vmul.f32 %v298_v30, %v246_v63 }
 0x584   :  { %v304_v29 = vpop.permute.xlu2 %303 }
 0x585   :  { %v306_v31 = vmul.f32 %v304_v29, %v298_v30 }
 0x587   :  { %308 = vrot.lane.b32.xlu0 %v306_v31, %s1481_s17 }
 0x5f9   :  { %v309_v33 = vpop.permute.xlu0 %308 }
 0x5fa   :  { %v311_v34 = vadd.f32 %v309_v33, %v301_v32 }
 0x5fc   :  { %1343 = vtanh.f32 %v311_v34 }
 0x602   :  { %v1344_v35 = vpop.eup %1343 }
 0x603   :  { %314 = vrot.lane.b32.xlu1 %v1344_v35, %s1480_s16 }
 0x675   :  { %v315_v37 = vpop.permute.xlu1 %314 }
 0x676   :  { %v317_v38 = vmul.f32 %v315_v37, %v298_v30 }
 0x678   :  { %319 = vrot.lane.b32.xlu2 %v317_v38, %s1481_s17 }
 0x6d2   :  { %v320_v39 = vpop.permute.xlu2 %319 }
 0x6d3   :  { %322 = vst.msk [vmem:[#allocation2 + $0x10] sm:$0xff] %vm126_vm6, %v320_v39  ;;  %1272 = vmatmul.msk.f32.vlgmr.msra.gmra.mxu1 %vm126_vm6, %v320_v39 }
 0x6da   :  { %v657_v40 = vld [vmem:[#allocation2 + $0x10] sm:$0xff] }
 0x6db   :  { %1289 = vmatmul.msk.f32.gmra.mxu3 %vm126_vm6, %v657_v40 }
 0x750   :  { %v342_v43 = vpop.f32.mrf.mxu1 }
 0x751   :  { %v345_v44 = vadd.f32 %v342_v43, %v112_v42 }
 0x753   :  { %1345 = vtanh.f32 %v345_v44  ;;  %v1273_v46 = vmul.f32 -1.442695, %v345_v44 }
 0x755   :  { %1347 = vpow2.f32 %v1273_v46 }
 0x759   :  { %v1346_v45 = vpop.eup %1345 }
 0x75a   :  { %368 = vrot.lane.b32.xlu0 %v1346_v45, %s1480_s16 }
 0x75b   :  { %v1348_v47 = vpop.eup %1347 }
 0x75c   :  { %v349_v48 = vadd.f32 1.0, %v1348_v47 }
 0x75e   :  { %1349 = vrcp.f32 %v349_v48  ;;  %v361_v54 = vand.u32 2147483648, %v349_v48  ;;  %vm355_vm0 = vweird.f32 %v349_v48  ;;  %v359_v55 = vand.u32 2147483647, %v349_v48 }
 0x760   :  { %v362_v57 = vor.u32 1.1754944e-38, %v361_v54  ;;  %vm360_vm3 = vcmp.eq.f32.partialorder %v359_v55, 8.507059e+37 }
 0x764   :  { %v1350_v49 = vpop.eup %1349 }
 0x765   :  { %v351_v50 = vmul.f32 %v1350_v49, %v349_v48  ;;  %vm356_vm15 = vweird.f32 %v1350_v49 }
 0x766   :  { %vm357_vm2 = vmor %vm355_vm0, %vm356_vm15 }
 0x767   :  { %v352_v51 = vsub.f32 1.0, %v351_v50 }
 0x769   :  { %v353_v52 = vmul.f32 %v1350_v49, %v352_v51 }
 0x76b   :  { %v354_v53 = vadd.f32 %v1350_v49, %v353_v52 }
 0x76d   :  { %v358_v56 = vsel %vm357_vm2, %v1350_v49, %v354_v53 }
 0x76e   :  { %v363_v59 = vsel %vm360_vm3, %v362_v57, %v358_v56 }
 0x76f   :  { %v366_v61 = vmul.f32 %v363_v59, %v311_v34  ;;  %v49_v34 = vld [vmem:[%s1809_s0 + $0x28] sm:$0xff] }
 0x770   :  { %1264 = vmatmul.msk.f32.gmra.mxu0 %vm56_vm1, %v49_v34 }
 0x7cc   :  { %v369_v58 = vpop.permute.xlu0 %368 }
 0x7cd   :  { %v371_v60 = vmul.f32 %v369_v58, %v363_v59 }
 0x7cf   :  { %373 = vrot.lane.b32.xlu1 %v371_v60, %s1481_s17 }
 0x7ed   :  { %v117_v37 = vpop.f32.mrf.mxu0 }
 0x7ee   :  { %v118_v38 = vadd.f32 %v1572_v7, %v117_v37 }
 0x841   :  { %v374_v62 = vpop.permute.xlu1 %373 }
 0x842   :  { %v376_v63 = vadd.f32 %v374_v62, %v366_v61  ;;  %v50_v61 = vld [vmem:[%s1809_s0 + $0x30] sm:$0xff] }
 0x843   :  { %1265 = vmatmul.msk.f32.gmra.mxu0 %vm56_vm1, %v50_v61 }
 0x844   :  { %1351 = vtanh.f32 %v376_v63 }
 0x84a   :  { %v1352_v2 = vpop.eup %1351 }
 0x84b   :  { %379 = vrot.lane.b32.xlu2 %v1352_v2, %s1480_s16  ;;  %v1661_v2 = vld [vmem:[%s1812_s3 + $0x38] sm:$0xff] }
 0x84c   :  { %747 = vmatpush.msra.mxu1 %v1661_v2 }
 0x8a5   :  { %v380_v3 = vpop.permute.xlu2 %379 }
 0x8a6   :  { %v382_v8 = vmul.f32 %v380_v3, %v363_v59  ;;  %v1666_v3 = vld [vmem:[%s1812_s3 + $0x30] sm:$0xff] }
 0x8a7   :  { %748 = vmatpush.msra.mxu1 %v1666_v3 }
 0x8a8   :  { %384 = vrot.lane.b32.xlu0 %v382_v8, %s1481_s17  ;;  %v1673_v8 = vld [vmem:[%s1812_s3 + $0x28] sm:$0xff] }
 0x8a9   :  { %749 = vmatpush.msra.mxu1 %v1673_v8 }
 0x8ab   :  { %750 = vmatpush.msra.mxu1 %v1680_v9 }
 0x8c0   :  { %v120_v12 = vpop.f32.mrf.mxu0 }
 0x91a   :  { %v385_v10 = vpop.permute.xlu0 %384 }
 0x91b   :  { %387 = vst.msk [vmem:[#allocation2 + $0x18] sm:$0xff] %vm126_vm6, %v385_v10  ;;  %1274 = vmatmul.msk.f32.vlgmr.msrb.gmra.mxu2 %vm126_vm6, %v385_v10 }
 0x91c   :  { %597 = vmatpush.msrb.mxu2 %v1524_v0 }
 0x91e   :  { %598 = vmatpush.msrb.mxu2 %v1529_v1 }
 0x920   :  { %599 = vmatpush.msrb.mxu2 %v1541_v4 }
 0x922   :  { %v658_v11 = vld [vmem:[#allocation2 + $0x18] sm:$0xff]  ;;  %600 = vmatpush.msrb.mxu2 %v1549_v5 }
 0x923   :  { %1290 = vmatmul.msk.f32.gmra.mxu3 %vm126_vm6, %v658_v11 }
 0x99e   :  { %v407_v14 = vpop.f32.mrf.mxu2 }
 0x99f   :  { %v410_v15 = vadd.f32 %v407_v14, %v115_v13  ;;  %v121_v13 = vadd.f32 %v1572_v7, %v120_v12 }
 0x9a1   :  { %1353 = vtanh.f32 %v410_v15  ;;  %v1275_v17 = vmul.f32 -1.442695, %v410_v15 }
 0x9a3   :  { %1355 = vpow2.f32 %v1275_v17 }
 0x9a7   :  { %v1354_v16 = vpop.eup %1353 }
 0x9a8   :  { %433 = vrot.lane.b32.xlu1 %v1354_v16, %s1480_s16  ;;  %v1702_v16 = vld [vmem:[%s1813_s4 + $0x1] ss:$0 sm:$0xff] }
 0x9a9   :  { %v1356_v0 = vpop.eup %1355 }
 0x9aa   :  { %v414_v1 = vadd.f32 1.0, %v1356_v0 }
 0x9ac   :  { %1357 = vrcp.f32 %v414_v1  ;;  %v426_v21 = vand.u32 2147483648, %v414_v1  ;;  %vm420_vm5 = vweird.f32 %v414_v1  ;;  %v424_v22 = vand.u32 2147483647, %v414_v1 }
 0x9ae   :  { %v427_v24 = vor.u32 1.1754944e-38, %v426_v21  ;;  %vm425_vm8 = vcmp.eq.f32.partialorder %v424_v22, 8.507059e+37 }
 0x9b2   :  { %v1358_v4 = vpop.eup %1357 }
 0x9b3   :  { %v416_v18 = vmul.f32 %v1358_v4, %v414_v1  ;;  %vm421_vm4 = vweird.f32 %v1358_v4 }
 0x9b4   :  { %vm422_vm7 = vmor %vm420_vm5, %vm421_vm4 }
 0x9b5   :  { %v417_v19 = vsub.f32 1.0, %v416_v18 }
 0x9b7   :  { %v418_v5 = vmul.f32 %v1358_v4, %v417_v19 }
 0x9b9   :  { %v419_v20 = vadd.f32 %v1358_v4, %v418_v5 }
 0x9bb   :  { %v423_v23 = vsel %vm422_vm7, %v1358_v4, %v419_v20 }
 0x9bc   :  { %v428_v26 = vsel %vm425_vm8, %v427_v24, %v423_v23 }
 0x9bd   :  { %v431_v28 = vmul.f32 %v428_v26, %v376_v63 }
 0xa1a   :  { %v434_v25 = vpop.permute.xlu1 %433 }
 0xa1b   :  { %v436_v27 = vmul.f32 %v434_v25, %v428_v26 }
 0xa1d   :  { %438 = vrot.lane.b32.xlu2 %v436_v27, %s1481_s17 }
 0xa77   :  { %v439_v29 = vpop.permute.xlu2 %438 }
 0xa78   :  { %v441_v30 = vadd.f32 %v439_v29, %v431_v28 }
 0xa7a   :  { %1359 = vtanh.f32 %v441_v30 }
 0xa80   :  { %v1360_v31 = vpop.eup %1359 }
 0xa81   :  { %444 = vrot.lane.b32.xlu0 %v1360_v31, %s1480_s16 }
 0xaf3   :  { %v445_v32 = vpop.permute.xlu0 %444 }
 0xaf4   :  { %v447_v33 = vmul.f32 %v445_v32, %v428_v26 }
 0xaf6   :  { %449 = vrot.lane.b32.xlu1 %v447_v33, %s1481_s17 }
 0xb68   :  { %v450_v35 = vpop.permute.xlu1 %449 }
 0xb69   :  { %452 = vst.msk [vmem:[#allocation2 + $0x20] sm:$0xff] %vm126_vm6, %v450_v35  ;;  %1276 = vmatmul.msk.f32.vlgmr.msra.gmra.mxu2 %vm126_vm6, %v450_v35 }
 0xb6a   :  { %810 = vmatpush.msra.mxu2 %v1661_v2 }
 0xb6c   :  { %811 = vmatpush.msra.mxu2 %v1666_v3 }
 0xb6e   :  { %812 = vmatpush.msra.mxu2 %v1673_v8 }
 0xb70   :  { %v659_v36 = vld [vmem:[#allocation2 + $0x20] sm:$0xff]  ;;  %813 = vmatpush.msra.mxu2 %v1680_v9 }
 0xb71   :  { %1291 = vmatmul.msk.f32.gmra.mxu3 %vm126_vm6, %v659_v36 }
 0xbec   :  { %v472_v39 = vpop.f32.mrf.mxu2 }
 0xbed   :  { %v475_v40 = vadd.f32 %v472_v39, %v118_v38 }
 0xbef   :  { %1361 = vtanh.f32 %v475_v40  ;;  %v1277_v42 = vmul.f32 -1.442695, %v475_v40 }
 0xbf1   :  { %1363 = vpow2.f32 %v1277_v42 }
 0xbf5   :  { %v1362_v41 = vpop.eup %1361 }
 0xbf6   :  { %498 = vrot.lane.b32.xlu2 %v1362_v41, %s1480_s16 }
 0xbf7   :  { %v1364_v43 = vpop.eup %1363 }
 0xbf8   :  { %v479_v44 = vadd.f32 1.0, %v1364_v43 }
 0xbfa   :  { %1365 = vrcp.f32 %v479_v44  ;;  %v491_v50 = vand.u32 2147483648, %v479_v44  ;;  %vm485_vm10 = vweird.f32 %v479_v44  ;;  %v489_v51 = vand.u32 2147483647, %v479_v44 }
 0xbfc   :  { %v492_v53 = vor.u32 1.1754944e-38, %v491_v50  ;;  %vm490_vm12 = vcmp.eq.f32.partialorder %v489_v51, 8.507059e+37 }
 0xc00   :  { %v1366_v45 = vpop.eup %1365 }
 0xc01   :  { %v481_v46 = vmul.f32 %v1366_v45, %v479_v44  ;;  %vm486_vm9 = vweird.f32 %v1366_v45 }
 0xc02   :  { %vm487_vm11 = vmor %vm485_vm10, %vm486_vm9 }
 0xc03   :  { %v482_v47 = vsub.f32 1.0, %v481_v46 }
 0xc05   :  { %v483_v48 = vmul.f32 %v1366_v45, %v482_v47 }
 0xc07   :  { %v484_v49 = vadd.f32 %v1366_v45, %v483_v48 }
 0xc09   :  { %v488_v52 = vsel %vm487_vm11, %v1366_v45, %v484_v49 }
 0xc0a   :  { %v493_v55 = vsel %vm490_vm12, %v492_v53, %v488_v52 }
 0xc0b   :  { %v496_v57 = vmul.f32 %v493_v55, %v441_v30 }
 0xc50   :  { %v499_v54 = vpop.permute.xlu2 %498 }
 0xc51   :  { %v501_v56 = vmul.f32 %v499_v54, %v493_v55 }
 0xc53   :  { %503 = vrot.lane.b32.xlu0 %v501_v56, %s1481_s17 }
 0xcc5   :  { %v504_v58 = vpop.permute.xlu0 %503 }
 0xcc6   :  { %v1649_v59 = vadd.f32 %v504_v58, %v496_v57 }
 0xcc8   :  { %1367 = vtanh.f32 %v1649_v59 }
 0xcce   :  { %v1368_v60 = vpop.eup %1367 }
 0xccf   :  { %509 = vrot.lane.b32.xlu1 %v1368_v60, %s1480_s16 }
 0xd41   :  { %v510_v62 = vpop.permute.xlu1 %509 }
 0xd42   :  { %v512_v63 = vmul.f32 %v510_v62, %v493_v55 }
 0xd44   :  { %514 = vrot.lane.b32.xlu2 %v512_v63, %s1481_s17 }
 0xd9e   :  { %v515_v10 = vpop.permute.xlu2 %514 }
 0xd9f   :  { %517 = vst.msk [vmem:[#allocation2 + $0x28] sm:$0xff] %vm126_vm6, %v515_v10  ;;  %1278 = vmatmul.msk.f32.vlgmr.msrb.gmra.mxu1 %vm126_vm6, %v515_v10 }
 0xda0   :  { %873 = vmatpush.msrb.mxu1 %v1661_v2 }
 0xda2   :  { %874 = vmatpush.msrb.mxu1 %v1666_v3 }
 0xda4   :  { %875 = vmatpush.msrb.mxu1 %v1673_v8 }
 0xda6   :  { %v660_v11 = vld [vmem:[#allocation2 + $0x28] sm:$0xff]  ;;  %876 = vmatpush.msrb.mxu1 %v1680_v9 }
 0xda7   :  { %1292 = vmatmul.msk.f32.gmra.mxu3 %vm126_vm6, %v660_v11  ;;  %751 = vmatmul.f32.vlgmr.msra.gmra.mxu1 %v1479_v6  ;;  %v711_v6 = vpop.f32.mrf.mxu3 }
 0xda8   :  { %999 = vmatpush.msra.mxu1 %v1661_v2  ;;  %v712_v17 = vadd.f32 %v1702_v16, %v711_v6 }
 0xdaa   :  { %1000 = vmatpush.msra.mxu1 %v1666_v3 }
 0xdac   :  { %1001 = vmatpush.msra.mxu1 %v1673_v8 }
 0xdae   :  { %1002 = vmatpush.msra.mxu1 %v1680_v9 }
 0xdaf   :  { %v714_v10 = vpop.f32.mrf.mxu3 }
 0xdb0   :  { %v715_v11 = vadd.f32 %v1702_v16, %v714_v10 }
 0xe1c   :  { %v537_v14 = vpop.f32.mrf.mxu1 }
 0xe1d   :  { %v540_v15 = vadd.f32 %v537_v14, %v121_v13 }
 0xe1f   :  { %1369 = vtanh.f32 %v540_v15  ;;  %v1279_v7 = vmul.f32 -1.442695, %v540_v15 }
 0xe24   :  { %v752_v0 = vpop.f32.mrf.mxu1 }
 0xe25   :  { %v1370_v1 = vpop.eup %1369  ;;  %v755_v4 = vadd.f32 %v752_v0, %v712_v17 }
 0xe26   :  { %563 = vrot.lane.b32.xlu0 %v1370_v1, %s1480_s16 }
 0xe27   :  { %1371 = vtanh.f32 %v755_v4  ;;  %v1295_v19 = vmul.f32 -1.442695, %v755_v4 }
 0xe28   :  { %1373 = vpow2.f32 %v1279_v7 }
 0xe29   :  { %1375 = vpow2.f32 %v1295_v19 }
 0xe2d   :  { %v1372_v18 = vpop.eup %1371 }
 0xe2e   :  { %778 = vrot.lane.b32.xlu1 %v1372_v18, %s1480_s16  ;;  %v1374_v5 = vpop.eup %1373 }
 0xe2f   :  { %v544_v20 = vadd.f32 1.0, %v1374_v5  ;;  %v1376_v21 = vpop.eup %1375 }
 0xe30   :  { %v759_v22 = vadd.f32 1.0, %v1376_v21 }
 0xe31   :  { %1377 = vrcp.f32 %v544_v20  ;;  %v556_v31 = vand.u32 2147483648, %v544_v20  ;;  %vm550_vm14 = vweird.f32 %v544_v20  ;;  %v554_v32 = vand.u32 2147483647, %v544_v20 }
 0xe32   :  { %1379 = vrcp.f32 %v759_v22  ;;  %v771_v40 = vand.u32 2147483648, %v759_v22  ;;  %vm765_vm3 = vweird.f32 %v759_v22  ;;  %v769_v41 = vand.u32 2147483647, %v759_v22 }
 0xe33   :  { %v557_v35 = vor.u32 1.1754944e-38, %v556_v31  ;;  %vm555_vm0 = vcmp.eq.f32.partialorder %v554_v32, 8.507059e+37  ;;  %v717_v32 = vpop.f32.mrf.mxu3 }
 0xe34   :  { %v772_v43 = vor.u32 1.1754944e-38, %v771_v40  ;;  %vm770_vm5 = vcmp.eq.f32.partialorder %v769_v41, 8.507059e+37 }
 0xe37   :  { %v1378_v23 = vpop.eup %1377 }
 0xe38   :  { %v546_v24 = vmul.f32 %v1378_v23, %v544_v20  ;;  %v1380_v26 = vpop.eup %1379  ;;  %vm551_vm13 = vweird.f32 %v1378_v23 }
 0xe39   :  { %v761_v28 = vmul.f32 %v1380_v26, %v759_v22  ;;  %vm552_vm15 = vmor %vm550_vm14, %vm551_vm13  ;;  %vm766_vm2 = vweird.f32 %v1380_v26 }
 0xe3a   :  { %v547_v25 = vsub.f32 1.0, %v546_v24  ;;  %vm767_vm4 = vmor %vm765_vm3, %vm766_vm2 }
 0xe3b   :  { %v762_v30 = vsub.f32 1.0, %v761_v28 }
 0xe3c   :  { %v548_v27 = vmul.f32 %v1378_v23, %v547_v25 }
 0xe3d   :  { %v763_v34 = vmul.f32 %v1380_v26, %v762_v30 }
 0xe3e   :  { %v549_v29 = vadd.f32 %v1378_v23, %v548_v27 }
 0xe3f   :  { %v764_v39 = vadd.f32 %v1380_v26, %v763_v34 }
 0xe40   :  { %v553_v33 = vsel %vm552_vm15, %v1378_v23, %v549_v29 }
 0xe41   :  { %v558_v37 = vsel %vm555_vm0, %v557_v35, %v553_v33  ;;  %v768_v42 = vsel %vm767_vm4, %v1380_v26, %v764_v39  ;;  %v718_v33 = vadd.f32 %v1702_v16, %v717_v32 }
 0xe42   :  { %v773_v45 = vsel %vm770_vm5, %v772_v43, %v768_v42  ;;  %v561_v47 = vmul.f32 %v558_v37, %v1649_v59  ;;  %v51_v59 = vld [vmem:[%s1809_s0 + $0x38] sm:$0xff] }
 0xe43   :  { %v776_v51 = vmul.f32 0.0, %v773_v45  ;;  %1266 = vmatmul.msk.f32.gmra.mxu0 %vm56_vm1, %v51_v59 }
 0xe98   :  { %v564_v36 = vpop.permute.xlu0 %563 }
 0xe99   :  { %v566_v38 = vmul.f32 %v564_v36, %v558_v37 }
 0xe9b   :  { %568 = vrot.lane.b32.xlu2 %v566_v38, %s1481_s17 }
 0xea0   :  { %v779_v44 = vpop.permute.xlu1 %778 }
 0xea1   :  { %v781_v46 = vmul.f32 %v779_v44, %v773_v45 }
 0xea3   :  { %783 = vrot.lane.b32.xlu0 %v781_v46, %s1481_s17 }
 0xef5   :  { %v569_v48 = vpop.permute.xlu2 %568 }
 0xef6   :  { %v1710_v49 = vadd.f32 %v569_v48, %v561_v47 }
 0xef8   :  { %1381 = vtanh.f32 %v1710_v49 }
 0xefe   :  { %v1382_v50 = vpop.eup %1381 }
 0xeff   :  { %574 = vrot.lane.b32.xlu1 %v1382_v50, %s1480_s16 }
 0xf15   :  { %v784_v52 = vpop.permute.xlu0 %783 }
 0xf16   :  { %v786_v53 = vadd.f32 %v784_v52, %v776_v51 }
 0xf18   :  { %1383 = vtanh.f32 %v786_v53 }
 0xf1e   :  { %v1384_v54 = vpop.eup %1383 }
 0xf1f   :  { %789 = vrot.lane.b32.xlu2 %v1384_v54, %s1480_s16 }
 0xf71   :  { %v575_v55 = vpop.permute.xlu1 %574 }
 0xf72   :  { %v577_v56 = vmul.f32 %v575_v55, %v558_v37 }
 0xf74   :  { %579 = vrot.lane.b32.xlu0 %v577_v56, %s1481_s17 }
 0xf79   :  { %v790_v57 = vpop.permute.xlu2 %789 }
 0xf7a   :  { %v792_v58 = vmul.f32 %v790_v57, %v773_v45 }
 0xf7c   :  { %794 = vrot.lane.b32.xlu1 %v792_v58, %s1481_s17 }
 0xfe6   :  { %v580_v60 = vpop.permute.xlu0 %579 }
 0xfe7   :  { %582 = vst.msk [vmem:[#allocation2 + $0x30] sm:$0xff] %vm126_vm6, %v580_v60  ;;  %1280 = vmatmul.msk.f32.vlgmr.msrb.gmra.mxu2 %vm126_vm6, %v580_v60  ;;  %v720_v60 = vpop.f32.mrf.mxu3 }
 0xfe8   :  { %936 = vmatpush.msrb.mxu2 %v1661_v2 }
 0xfea   :  { %937 = vmatpush.msrb.mxu2 %v1666_v3 }
 0xfec   :  { %938 = vmatpush.msrb.mxu2 %v1673_v8 }
 0xfee   :  { %v795_v61 = vpop.permute.xlu1 %794  ;;  %v661_v62 = vld [vmem:[#allocation2 + $0x30] sm:$0xff]  ;;  %939 = vmatpush.msrb.mxu2 %v1680_v9 }
 0xfef   :  { %1293 = vmatmul.msk.f32.gmra.mxu3 %vm126_vm6, %v661_v62  ;;  %1296 = vmatmul.msk.f32.vlgmr.msra.gmra.mxu2 %vm126_vm6, %v795_v61  ;;  %v721_v61 = vadd.f32 %v1702_v16, %v720_v60 }
 0xff0   :  { %1062 = vmatpush.msra.mxu2 %v1661_v2 }
 0xff2   :  { %1063 = vmatpush.msra.mxu2 %v1666_v3 }
 0xff4   :  { %1064 = vmatpush.msra.mxu2 %v1673_v8 }
 0xff6   :  { %1065 = vmatpush.msra.mxu2 %v1680_v9 }
0x106a   :  { %v1733_v63 = vpop.f32.mrf.mxu2 }
0x1072   :  { %v815_v12 = vpop.f32.mrf.mxu2 }
0x1073   :  { %v818_v13 = vadd.f32 %v815_v12, %v715_v11 }
0x1075   :  { %1385 = vtanh.f32 %v818_v13  ;;  %v1297_v15 = vmul.f32 -1.442695, %v818_v13 }
0x1077   :  { %1387 = vpow2.f32 %v1297_v15 }
0x107b   :  { %v1386_v14 = vpop.eup %1385 }
0x107c   :  { %841 = vrot.lane.b32.xlu2 %v1386_v14, %s1480_s16 }
0x107d   :  { %v1388_v6 = vpop.eup %1387 }
0x107e   :  { %v822_v17 = vadd.f32 1.0, %v1388_v6 }
0x1080   :  { %1389 = vrcp.f32 %v822_v17  ;;  %v834_v19 = vand.u32 2147483648, %v822_v17  ;;  %vm828_vm7 = vweird.f32 %v822_v17  ;;  %v832_v5 = vand.u32 2147483647, %v822_v17 }
0x1082   :  { %v835_v21 = vor.u32 1.1754944e-38, %v834_v19  ;;  %vm833_vm9 = vcmp.eq.f32.partialorder %v832_v5, 8.507059e+37 }
0x1086   :  { %v1390_v0 = vpop.eup %1389 }
0x1087   :  { %v824_v1 = vmul.f32 %v1390_v0, %v822_v17  ;;  %vm829_vm1 = vweird.f32 %v1390_v0 }
0x1088   :  { %vm830_vm8 = vmor %vm828_vm7, %vm829_vm1 }
0x1089   :  { %v825_v4 = vsub.f32 1.0, %v824_v1 }
0x108b   :  { %v826_v18 = vmul.f32 %v1390_v0, %v825_v4 }
0x108d   :  { %v827_v7 = vadd.f32 %v1390_v0, %v826_v18 }
0x108f   :  { %v831_v20 = vsel %vm830_vm8, %v1390_v0, %v827_v7 }
0x1090   :  { %v836_v23 = vsel %vm833_vm9, %v835_v21, %v831_v20 }
0x1091   :  { %v839_v25 = vmul.f32 %v836_v23, %v786_v53 }
0x10d6   :  { %v842_v22 = vpop.permute.xlu2 %841 }
0x10d7   :  { %v844_v24 = vmul.f32 %v842_v22, %v836_v23 }
0x10d9   :  { %846 = vrot.lane.b32.xlu0 %v844_v24, %s1481_s17 }
0x114b   :  { %v847_v26 = vpop.permute.xlu0 %846 }
0x114c   :  { %v849_v27 = vadd.f32 %v847_v26, %v839_v25  ;;  %v723_v25 = vpop.f32.mrf.mxu3 }
0x114d   :  { %v724_v26 = vadd.f32 %v1702_v16, %v723_v25 }
0x114e   :  { %1391 = vtanh.f32 %v849_v27 }
0x1154   :  { %v1392_v28 = vpop.eup %1391 }
0x1155   :  { %852 = vrot.lane.b32.xlu1 %v1392_v28, %s1480_s16 }
0x11c7   :  { %v853_v29 = vpop.permute.xlu1 %852 }
0x11c8   :  { %v855_v30 = vmul.f32 %v853_v29, %v836_v23 }
0x11ca   :  { %857 = vrot.lane.b32.xlu2 %v855_v30, %s1481_s17 }
0x1224   :  { %v858_v31 = vpop.permute.xlu2 %857 }
0x1225   :  { %1298 = vmatmul.msk.f32.vlgmr.msrb.gmra.mxu1 %vm126_vm6, %v858_v31 }
0x1226   :  { %1125 = vmatpush.msrb.mxu1 %v1661_v2 }
0x1228   :  { %1126 = vmatpush.msrb.mxu1 %v1666_v3 }
0x122a   :  { %1127 = vmatpush.msrb.mxu1 %v1673_v8 }
0x122c   :  { %1128 = vmatpush.msrb.mxu1 %v1680_v9 }
0x12a2   :  { %v878_v34 = vpop.f32.mrf.mxu1 }
0x12a3   :  { %v881_v35 = vadd.f32 %v878_v34, %v718_v33 }
0x12a5   :  { %1393 = vtanh.f32 %v881_v35  ;;  %v1299_v37 = vmul.f32 -1.442695, %v881_v35 }
0x12a7   :  { %1395 = vpow2.f32 %v1299_v37 }
0x12ab   :  { %v1394_v36 = vpop.eup %1393 }
0x12ac   :  { %904 = vrot.lane.b32.xlu0 %v1394_v36, %s1480_s16 }
0x12ad   :  { %v1396_v38 = vpop.eup %1395 }
0x12ae   :  { %v885_v39 = vadd.f32 1.0, %v1396_v38 }
0x12b0   :  { %1397 = vrcp.f32 %v885_v39  ;;  %v897_v45 = vand.u32 2147483648, %v885_v39  ;;  %vm891_vm11 = vweird.f32 %v885_v39  ;;  %v895_v46 = vand.u32 2147483647, %v885_v39 }
0x12b2   :  { %v898_v48 = vor.u32 1.1754944e-38, %v897_v45  ;;  %vm896_vm13 = vcmp.eq.f32.partialorder %v895_v46, 8.507059e+37 }
0x12b6   :  { %v1398_v40 = vpop.eup %1397 }
0x12b7   :  { %v887_v41 = vmul.f32 %v1398_v40, %v885_v39  ;;  %vm892_vm10 = vweird.f32 %v1398_v40 }
0x12b8   :  { %vm893_vm12 = vmor %vm891_vm11, %vm892_vm10 }
0x12b9   :  { %v888_v42 = vsub.f32 1.0, %v887_v41 }
0x12bb   :  { %v889_v43 = vmul.f32 %v1398_v40, %v888_v42 }
0x12bd   :  { %v890_v44 = vadd.f32 %v1398_v40, %v889_v43 }
0x12bf   :  { %v894_v47 = vsel %vm893_vm12, %v1398_v40, %v890_v44 }
0x12c0   :  { %v899_v51 = vsel %vm896_vm13, %v898_v48, %v894_v47 }
0x12c1   :  { %v902_v53 = vmul.f32 %v899_v51, %v849_v27 }
0x131e   :  { %v905_v50 = vpop.permute.xlu0 %904 }
0x131f   :  { %v907_v52 = vmul.f32 %v905_v50, %v899_v51 }
0x1321   :  { %909 = vrot.lane.b32.xlu1 %v907_v52, %s1481_s17 }
0x1393   :  { %v910_v54 = vpop.permute.xlu1 %909 }
0x1394   :  { %v912_v55 = vadd.f32 %v910_v54, %v902_v53  ;;  %v726_v53 = vpop.f32.mrf.mxu3 }
0x1395   :  { %v727_v54 = vadd.f32 %v1702_v16, %v726_v53 }
0x1396   :  { %1399 = vtanh.f32 %v912_v55 }
0x139c   :  { %v1400_v56 = vpop.eup %1399 }
0x139d   :  { %915 = vrot.lane.b32.xlu2 %v1400_v56, %s1480_s16 }
0x13f7   :  { %v916_v57 = vpop.permute.xlu2 %915 }
0x13f8   :  { %v918_v58 = vmul.f32 %v916_v57, %v899_v51 }
0x13fa   :  { %920 = vrot.lane.b32.xlu0 %v918_v58, %s1481_s17 }
0x146c   :  { %v921_v59 = vpop.permute.xlu0 %920 }
0x146d   :  { %1300 = vmatmul.msk.f32.vlgmr.msrb.gmra.mxu2 %vm126_vm6, %v921_v59 }
0x146e   :  { %1188 = vmatpush.msrb.mxu2 %v1661_v2 }
0x1470   :  { %1189 = vmatpush.msrb.mxu2 %v1666_v3 }
0x1472   :  { %1190 = vmatpush.msrb.mxu2 %v1673_v8 }
0x1474   :  { %1191 = vmatpush.msrb.mxu2 %v1680_v9 }
0x14f0   :  { %v941_v62 = vpop.f32.mrf.mxu2 }
0x14f1   :  { %v944_v10 = vadd.f32 %v941_v62, %v721_v61 }
0x14f3   :  { %1401 = vtanh.f32 %v944_v10  ;;  %v1301_v12 = vmul.f32 -1.442695, %v944_v10 }
0x14f5   :  { %1403 = vpow2.f32 %v1301_v12  ;;  %v123_v12 = vpop.f32.mrf.mxu0 }
0x14f9   :  { %v1402_v11 = vpop.eup %1401 }
0x14fa   :  { %967 = vrot.lane.b32.xlu1 %v1402_v11, %s1480_s16 }
0x14fb   :  { %v1404_v13 = vpop.eup %1403 }
0x14fc   :  { %v948_v14 = vadd.f32 1.0, %v1404_v13 }
0x14fe   :  { %1405 = vrcp.f32 %v948_v14  ;;  %v960_v9 = vand.u32 2147483648, %v948_v14  ;;  %vm954_vm15 = vweird.f32 %v948_v14  ;;  %v958_v17 = vand.u32 2147483647, %v948_v14 }
0x1500   :  { %v961_v1 = vor.u32 1.1754944e-38, %v960_v9  ;;  %vm959_vm2 = vcmp.eq.f32.partialorder %v958_v17, 8.507059e+37 }
0x1504   :  { %v1406_v2 = vpop.eup %1405 }
0x1505   :  { %v950_v3 = vmul.f32 %v1406_v2, %v948_v14  ;;  %vm955_vm14 = vweird.f32 %v1406_v2 }
0x1506   :  { %vm956_vm0 = vmor %vm954_vm15, %vm955_vm14 }
0x1507   :  { %v951_v15 = vsub.f32 1.0, %v950_v3  ;;  %v1449_v3 = vld [vmem:[%s1813_s4] ss:$0 sm:$0xff] }
0x1509   :  { %v952_v8 = vmul.f32 %v1406_v2, %v951_v15  ;;  %v124_v15 = vadd.f32 %v1449_v3, %v123_v12 }
0x150b   :  { %v953_v6 = vadd.f32 %v1406_v2, %v952_v8  ;;  %v605_v9 = vadd.f32 %v1733_v63, %v124_v15 }
0x150d   :  { %v957_v0 = vsel %vm956_vm0, %v1406_v2, %v953_v6 }
0x150e   :  { %v962_v18 = vsel %vm959_vm2, %v961_v1, %v957_v0 }
0x150f   :  { %v965_v19 = vmul.f32 %v962_v18, %v912_v55 }
0x156c   :  { %v968_v4 = vpop.permute.xlu1 %967 }
0x156d   :  { %v970_v7 = vmul.f32 %v968_v4, %v962_v18 }
0x156f   :  { %972 = vrot.lane.b32.xlu2 %v970_v7, %s1481_s17 }
0x15c9   :  { %v973_v5 = vpop.permute.xlu2 %972 }
0x15ca   :  { %v975_v20 = vadd.f32 %v973_v5, %v965_v19 }
0x15cc   :  { %1407 = vtanh.f32 %v975_v20 }
0x15d2   :  { %v1408_v21 = vpop.eup %1407 }
0x15d3   :  { %978 = vrot.lane.b32.xlu0 %v1408_v21, %s1480_s16 }
0x1645   :  { %v979_v22 = vpop.permute.xlu0 %978 }
0x1646   :  { %v981_v23 = vmul.f32 %v979_v22, %v962_v18 }
0x1648   :  { %983 = vrot.lane.b32.xlu1 %v981_v23, %s1481_s17 }
0x16ba   :  { %v984_v24 = vpop.permute.xlu1 %983 }
0x16bb   :  { %1302 = vmatmul.msk.f32.vlgmr.msra.gmra.mxu1 %vm126_vm6, %v984_v24 }
0x1738   :  { %v1004_v27 = vpop.f32.mrf.mxu1 }
0x1739   :  { %v1007_v28 = vadd.f32 %v1004_v27, %v724_v26 }
0x173b   :  { %1409 = vtanh.f32 %v1007_v28  ;;  %v1303_v30 = vmul.f32 -1.442695, %v1007_v28 }
0x173d   :  { %1411 = vpow2.f32 %v1303_v30 }
0x1741   :  { %v1410_v29 = vpop.eup %1409 }
0x1742   :  { %1030 = vrot.lane.b32.xlu2 %v1410_v29, %s1480_s16 }
0x1743   :  { %v1412_v31 = vpop.eup %1411 }
0x1744   :  { %v1011_v32 = vadd.f32 1.0, %v1412_v31 }
0x1746   :  { %1413 = vrcp.f32 %v1011_v32  ;;  %v1023_v38 = vand.u32 2147483648, %v1011_v32  ;;  %vm1017_vm4 = vweird.f32 %v1011_v32  ;;  %v1021_v39 = vand.u32 2147483647, %v1011_v32 }
0x1748   :  { %v1024_v41 = vor.u32 1.1754944e-38, %v1023_v38  ;;  %vm1022_vm1 = vcmp.eq.f32.partialorder %v1021_v39, 8.507059e+37 }
0x174c   :  { %v1414_v33 = vpop.eup %1413 }
0x174d   :  { %v1013_v34 = vmul.f32 %v1414_v33, %v1011_v32  ;;  %vm1018_vm3 = vweird.f32 %v1414_v33 }
0x174e   :  { %vm1019_vm5 = vmor %vm1017_vm4, %vm1018_vm3 }
0x174f   :  { %v1014_v35 = vsub.f32 1.0, %v1013_v34 }
0x1751   :  { %v1015_v36 = vmul.f32 %v1414_v33, %v1014_v35 }
0x1753   :  { %v1016_v37 = vadd.f32 %v1414_v33, %v1015_v36 }
0x1755   :  { %v1020_v40 = vsel %vm1019_vm5, %v1414_v33, %v1016_v37  ;;  %v729_v37 = vpop.f32.mrf.mxu3 }
0x1756   :  { %v1025_v43 = vsel %vm1022_vm1, %v1024_v41, %v1020_v40  ;;  %v730_v38 = vadd.f32 %v1702_v16, %v729_v37 }
0x1757   :  { %v1028_v45 = vmul.f32 %v1025_v43, %v975_v20  ;;  %v1281_v20 = vmul.f32 -1.442695, %v605_v9 }
0x179c   :  { %v1031_v42 = vpop.permute.xlu2 %1030 }
0x179d   :  { %v1033_v44 = vmul.f32 %v1031_v42, %v1025_v43 }
0x179f   :  { %1035 = vrot.lane.b32.xlu0 %v1033_v44, %s1481_s17 }
0x1811   :  { %v1036_v46 = vpop.permute.xlu0 %1035 }
0x1812   :  { %v1038_v47 = vadd.f32 %v1036_v46, %v1028_v45 }
0x1814   :  { %1415 = vtanh.f32 %v1038_v47 }
0x181a   :  { %v1416_v48 = vpop.eup %1415 }
0x181b   :  { %1041 = vrot.lane.b32.xlu1 %v1416_v48, %s1480_s16 }
0x188d   :  { %v1042_v50 = vpop.permute.xlu1 %1041 }
0x188e   :  { %v1044_v51 = vmul.f32 %v1042_v50, %v1025_v43 }
0x1890   :  { %1046 = vrot.lane.b32.xlu2 %v1044_v51, %s1481_s17 }
0x18ea   :  { %v1047_v52 = vpop.permute.xlu2 %1046 }
0x18eb   :  { %1304 = vmatmul.msk.f32.vlgmr.msra.gmra.mxu2 %vm126_vm6, %v1047_v52 }
0x196e   :  { %v1067_v55 = vpop.f32.mrf.mxu2 }
0x196f   :  { %v1070_v56 = vadd.f32 %v1067_v55, %v727_v54 }
0x1971   :  { %1417 = vtanh.f32 %v1070_v56  ;;  %v1305_v58 = vmul.f32 -1.442695, %v1070_v56 }
0x1973   :  { %1419 = vpow2.f32 %v1305_v58 }
0x1977   :  { %v1418_v57 = vpop.eup %1417 }
0x1978   :  { %1093 = vrot.lane.b32.xlu0 %v1418_v57, %s1480_s16 }
0x1979   :  { %v1420_v59 = vpop.eup %1419 }
0x197a   :  { %v1074_v60 = vadd.f32 1.0, %v1420_v59 }
0x197c   :  { %1421 = vrcp.f32 %v1074_v60  ;;  %v1086_v14 = vand.u32 2147483648, %v1074_v60  ;;  %vm1080_vm8 = vweird.f32 %v1074_v60  ;;  %v1084_v2 = vand.u32 2147483647, %v1074_v60 }
0x197d   :  { %1423 = vtanh.f32 %v605_v9 }
0x197e   :  { %v1087_v6 = vor.u32 1.1754944e-38, %v1086_v14  ;;  %vm1085_vm10 = vcmp.eq.f32.partialorder %v1084_v2, 8.507059e+37 }
0x1982   :  { %v1422_v61 = vpop.eup %1421 }
0x1983   :  { %v1076_v62 = vmul.f32 %v1422_v61, %v1074_v60  ;;  %vm1081_vm7 = vweird.f32 %v1422_v61  ;;  %v1424_v4 = vpop.eup %1423 }
0x1984   :  { %vm1082_vm9 = vmor %vm1080_vm8, %vm1081_vm7  ;;  %vm1251_vm8 = vcmask 7168  }
0x1985   :  { %v1077_v10 = vsub.f32 1.0, %v1076_v62 }
0x1987   :  { %v1078_v11 = vmul.f32 %v1422_v61, %v1077_v10 }
0x1989   :  { %v1079_v13 = vadd.f32 %v1422_v61, %v1078_v11 }
0x198b   :  { %v1083_v8 = vsel %vm1082_vm9, %v1422_v61, %v1079_v13 }
0x198c   :  { %v1088_v0 = vsel %vm1085_vm10, %v1087_v6, %v1083_v8 }
0x198d   :  { %v1091_v18 = vmul.f32 %v1088_v0, %v1038_v47 }
0x19ea   :  { %v1094_v17 = vpop.permute.xlu0 %1093 }
0x19eb   :  { %v1096_v1 = vmul.f32 %v1094_v17, %v1088_v0 }
0x19ed   :  { %1098 = vrot.lane.b32.xlu1 %v1096_v1, %s1481_s17 }
0x19f5   :  { %628 = vrot.lane.b32.xlu1 %v1424_v4, %s1480_s16 }
0x1a5f   :  { %v1099_v7 = vpop.permute.xlu1 %1098 }
0x1a60   :  { %v1775_v19 = vadd.f32 %v1099_v7, %v1091_v18 }
0x1a62   :  { %1425 = vtanh.f32 %v1775_v19 }
0x1a63   :  { %1427 = vpow2.f32 %v1281_v20 }
0x1a67   :  { %v629_v33 = vpop.permute.xlu1 %628 }
0x1a68   :  { %v1426_v5 = vpop.eup %1425 }
0x1a69   :  { %1104 = vrot.lane.b32.xlu2 %v1426_v5, %s1480_s16  ;;  %v1428_v63 = vpop.eup %1427 }
0x1a6a   :  { %v609_v21 = vadd.f32 1.0, %v1428_v63 }
0x1a6c   :  { %1429 = vrcp.f32 %v609_v21  ;;  %v621_v29 = vand.u32 2147483648, %v609_v21  ;;  %vm615_vm12 = vweird.f32 %v609_v21  ;;  %v619_v30 = vand.u32 2147483647, %v609_v21 }
0x1a6e   :  { %v622_v32 = vor.u32 1.1754944e-38, %v621_v29  ;;  %vm620_vm14 = vcmp.eq.f32.partialorder %v619_v30, 8.507059e+37 }
0x1a72   :  { %v1430_v22 = vpop.eup %1429 }
0x1a73   :  { %v611_v23 = vmul.f32 %v1430_v22, %v609_v21  ;;  %vm616_vm11 = vweird.f32 %v1430_v22 }
0x1a74   :  { %vm617_vm13 = vmor %vm615_vm12, %vm616_vm11 }
0x1a75   :  { %v612_v24 = vsub.f32 1.0, %v611_v23 }
0x1a77   :  { %v613_v25 = vmul.f32 %v1430_v22, %v612_v24 }
0x1a79   :  { %v614_v27 = vadd.f32 %v1430_v22, %v613_v25 }
0x1a7b   :  { %v618_v31 = vsel %vm617_vm13, %v1430_v22, %v614_v27 }
0x1a7c   :  { %v623_v34 = vsel %vm620_vm14, %v622_v32, %v618_v31 }
0x1a7d   :  { %v631_v35 = vmul.f32 %v629_v33, %v623_v34  ;;  %v626_v42 = vmul.f32 %v623_v34, %v1710_v49 }
0x1ac3   :  { %v1105_v26 = vpop.permute.xlu2 %1104 }
0x1ac4   :  { %v1107_v28 = vmul.f32 %v1105_v26, %v1088_v0 }
0x1ac6   :  { %1109 = vrot.lane.b32.xlu0 %v1107_v28, %s1481_s17 }
0x1ace   :  { %633 = vrot.lane.b32.xlu0 %v631_v35, %s1481_s17 }
0x1b38   :  { %v1110_v36 = vpop.permute.xlu0 %1109 }
0x1b39   :  { %1306 = vmatmul.msk.f32.vlgmr.msrb.gmra.mxu1 %vm126_vm6, %v1110_v36 }
0x1b40   :  { %v634_v41 = vpop.permute.xlu0 %633 }
0x1b41   :  { %v636_v43 = vadd.f32 %v634_v41, %v626_v42 }
0x1bb6   :  { %v1130_v39 = vpop.f32.mrf.mxu1 }
0x1bb7   :  { %v1133_v40 = vadd.f32 %v1130_v39, %v730_v38  ;;  %v1320_v39 = vld [vmem:[%s1814_s5 + $0x1] ss:$0 sm:$0xff] }
0x1bb9   :  { %1431 = vtanh.f32 %v1133_v40  ;;  %v1307_v46 = vmul.f32 -1.442695, %v1133_v40 }
0x1bba   :  { %1433 = vtanh.f32 %v636_v43 }
0x1bbb   :  { %1435 = vpow2.f32 %v1307_v46 }
0x1bbf   :  { %v1432_v44 = vpop.eup %1431 }
0x1bc0   :  { %1156 = vrot.lane.b32.xlu2 %v1432_v44, %s1480_s16  ;;  %v1434_v45 = vpop.eup %1433 }
0x1bc1   :  { %v1436_v47 = vpop.eup %1435 }
0x1bc2   :  { %v1137_v48 = vadd.f32 1.0, %v1436_v47 }
0x1bc4   :  { %1437 = vrcp.f32 %v1137_v48  ;;  %v1149_v49 = vand.u32 2147483648, %v1137_v48  ;;  %vm1143_vm0 = vweird.f32 %v1137_v48  ;;  %v1147_v55 = vand.u32 2147483647, %v1137_v48 }
0x1bc6   :  { %v1150_v57 = vor.u32 1.1754944e-38, %v1149_v49  ;;  %vm1148_vm3 = vcmp.eq.f32.partialorder %v1147_v55, 8.507059e+37 }
0x1bc8   :  { %639 = vrot.lane.b32.xlu2 %v1434_v45, %s1480_s16 }
0x1bca   :  { %v1438_v50 = vpop.eup %1437 }
0x1bcb   :  { %v1139_v51 = vmul.f32 %v1438_v50, %v1137_v48  ;;  %vm1144_vm15 = vweird.f32 %v1438_v50 }
0x1bcc   :  { %vm1145_vm2 = vmor %vm1143_vm0, %vm1144_vm15 }
0x1bcd   :  { %v1140_v52 = vsub.f32 1.0, %v1139_v51 }
0x1bcf   :  { %v1141_v53 = vmul.f32 %v1438_v50, %v1140_v52 }
0x1bd1   :  { %v1142_v54 = vadd.f32 %v1438_v50, %v1141_v53 }
0x1bd3   :  { %v1146_v56 = vsel %vm1145_vm2, %v1438_v50, %v1142_v54 }
0x1bd4   :  { %v1151_v59 = vsel %vm1148_vm3, %v1150_v57, %v1146_v56 }
0x1bd5   :  { %v1154_v10 = vmul.f32 %v1151_v59, %v1775_v19  ;;  %v1319_v19 = vld [vmem:[%s1814_s5] ss:$0 sm:$0xff] }
0x1c1a   :  { %v1157_v58 = vpop.permute.xlu2 %1156 }
0x1c1b   :  { %v1159_v60 = vmul.f32 %v1157_v58, %v1151_v59 }
0x1c1d   :  { %1161 = vrot.lane.b32.xlu1 %v1159_v60, %s1481_s17 }
0x1c22   :  { %v640_v61 = vpop.permute.xlu2 %639 }
0x1c23   :  { %v642_v62 = vmul.f32 %v640_v61, %v623_v34 }
0x1c25   :  { %644 = vrot.lane.b32.xlu1 %v642_v62, %s1481_s17 }
0x1c8f   :  { %v1162_v11 = vpop.permute.xlu1 %1161 }
0x1c90   :  { %v1164_v12 = vadd.f32 %v1162_v11, %v1154_v10 }
0x1c92   :  { %1439 = vtanh.f32 %v1164_v12 }
0x1c97   :  { %v645_v13 = vpop.permute.xlu1 %644 }
0x1c98   :  { %v1440_v14 = vpop.eup %1439  ;;  %647 = vst.msk [vmem:[#allocation2 + $0x38] sm:$0xff] %vm126_vm6, %v645_v13 }
0x1c99   :  { %1167 = vrot.lane.b32.xlu0 %v1440_v14, %s1480_s16 }
0x1c9f   :  { %v662_v2 = vld [vmem:[#allocation2 + $0x38] sm:$0xff] }
0x1ca0   :  { %1294 = vmatmul.msk.f32.gmra.mxu3 %vm126_vm6, %v662_v2 }
0x1d0b   :  { %v1168_v3 = vpop.permute.xlu0 %1167 }
0x1d0c   :  { %v1170_v15 = vmul.f32 %v1168_v3, %v1151_v59 }
0x1d0e   :  { %1172 = vrot.lane.b32.xlu2 %v1170_v15, %s1481_s17 }
0x1d23   :  { %v732_v6 = vpop.f32.mrf.mxu3 }
0x1d24   :  { %v733_v9 = vadd.f32 %v1702_v16, %v732_v6 }
0x1d68   :  { %v1173_v8 = vpop.permute.xlu2 %1172 }
0x1d69   :  { %1308 = vmatmul.msk.f32.vlgmr.msrb.gmra.mxu2 %vm126_vm6, %v1173_v8 }
0x1dec   :  { %v1193_v17 = vpop.f32.mrf.mxu2 }
0x1ded   :  { %v1196_v0 = vadd.f32 %v1193_v17, %v733_v9 }
0x1def   :  { %1441 = vtanh.f32 %v1196_v0  ;;  %v1309_v4 = vmul.f32 -1.442695, %v1196_v0 }
0x1df1   :  { %1443 = vpow2.f32 %v1309_v4 }
0x1df5   :  { %v1442_v1 = vpop.eup %1441 }
0x1df6   :  { %1219 = vrot.lane.b32.xlu0 %v1442_v1, %s1480_s16 }
0x1df7   :  { %v1444_v18 = vpop.eup %1443 }
0x1df8   :  { %v1200_v7 = vadd.f32 1.0, %v1444_v18 }
0x1dfa   :  { %1445 = vrcp.f32 %v1200_v7  ;;  %v1212_v22 = vand.u32 2147483648, %v1200_v7  ;;  %vm1206_vm5 = vweird.f32 %v1200_v7  ;;  %v1210_v23 = vand.u32 2147483647, %v1200_v7 }
0x1dfc   :  { %v1213_v25 = vor.u32 1.1754944e-38, %v1212_v22  ;;  %vm1211_vm7 = vcmp.eq.f32.partialorder %v1210_v23, 8.507059e+37 }
0x1dfe   :  { %1237 = vrot.lane.b32.xlu0 %v1319_v19, %s1482_s19 }
0x1e00   :  { %v1446_v5 = vpop.eup %1445 }
0x1e01   :  { %v1202_v20 = vmul.f32 %v1446_v5, %v1200_v7  ;;  %vm1207_vm4 = vweird.f32 %v1446_v5 }
0x1e02   :  { %vm1208_vm1 = vmor %vm1206_vm5, %vm1207_vm4 }
0x1e03   :  { %v1203_v16 = vsub.f32 1.0, %v1202_v20 }
0x1e05   :  { %v1204_v63 = vmul.f32 %v1446_v5, %v1203_v16 }
0x1e07   :  { %v1205_v21 = vadd.f32 %v1446_v5, %v1204_v63 }
0x1e09   :  { %v1209_v24 = vsel %vm1208_vm1, %v1446_v5, %v1205_v21 }
0x1e0a   :  { %v1214_v27 = vsel %vm1211_vm7, %v1213_v25, %v1209_v24 }
0x1e0b   :  { %v1217_v29 = vmul.f32 %v1214_v27, %v1164_v12 }
0x1e68   :  { %v1220_v26 = vpop.permute.xlu0 %1219 }
0x1e69   :  { %v1222_v28 = vmul.f32 %v1220_v26, %v1214_v27 }
0x1e6b   :  { %1224 = vrot.lane.b32.xlu1 %v1222_v28, %s1481_s17 }
0x1e70   :  { %v1238_v34 = vpop.permute.xlu0 %1237 }
0x1edd   :  { %v1225_v30 = vpop.permute.xlu1 %1224 }
0x1ede   :  { %v1227_v31 = vadd.f32 %v1225_v30, %v1217_v29 }
0x1ee0   :  { %1447 = vtanh.f32 %v1227_v31 }
0x1ee6   :  { %v1448_v32 = vpop.eup %1447 }
0x1ee7   :  { %1230 = vrot.lane.b32.xlu2 %v1448_v32, %s1480_s16 }
0x1f41   :  { %v1231_v33 = vpop.permute.xlu2 %1230 }
0x1f42   :  { %v1233_v35 = vmul.f32 %v1231_v33, %v1214_v27 }
0x1f44   :  { %v1240_v36 = vmul.f32 %v1238_v34, %v1233_v35 }
0x1f46   :  { %1242 = vrot.lane.b32.xlu1 %v1240_v36, %s1481_s17 }
0x1fb8   :  { %v1243_v37 = vpop.permute.xlu1 %1242 }
0x1fb9   :  { %v1245_v38 = vsel %vm126_vm6, %v1243_v37, 0.0 }
0x1fba   :  { %1246 = vadd.xlane.f32.xlu2 %v1245_v38 }
0x202d   :  { %v1247_v40 = vpop.xlane.xlu2 %1246 }
0x202e   :  { %v1250_v41 = vadd.f32 %v1320_v39, %v1247_v40 }
0x2030   :  { %1252 = vst.msk [vmem:[%s1815_s6] sm:$0xff] %vm1251_vm8, %v1250_v41 }
0x2031   :  { %1257 = vsyncpa [#allocation4], 1 }

</bundles_post_ra>
